<compile_context>
chip_gen: v5e
topology: v5e:2x2
jax: 0.10.0
libtpu: 0.0.40
codegen_flags: <defaults>
</compile_context>

<pallas_src>
import jax
import jax.numpy as jnp
from jax.experimental import pallas as pl
from jax.experimental.pallas import tpu as pltpu


def _round_up(n, m):
    return ((n + m - 1) // m) * m


def _pack_rows(blocks):
    """Row-concatenate 2-D blocks (same lane width), padding each to 8 rows.

    Packing all parameter tensors into one slab reduces DMA-issue overhead and
    keeps every in-kernel slice sublane-aligned (static, zero-cost views).
    """
    padded, offs, off = [], [], 0
    for b in blocks:
        r = b.shape[0]
        rp = _round_up(r, 8)
        padded.append(jnp.pad(b, ((0, rp - r), (0, 0))))
        offs.append(off)
        off += rp
    return jnp.concatenate(padded, axis=0), tuple(offs)


def _make_kernel(T, BB, Dp, H, offs):
    """Kernel body with all shapes / slab offsets baked in as statics."""
    (o_wih0, o_b0, o_whh0, o_wih1, o_whh1, o_b1,
     o_wf1, o_bf1, o_w2, o_b2) = offs
    G = 4 * H
    f32 = jnp.float32

    def kernel(x_ref, w_ref, out_ref):
        # ---- parameter slices (static, sublane-aligned views) ----
        wih0 = w_ref[o_wih0:o_wih0 + Dp, :]       # (Dp, 4H)
        b0 = w_ref[o_b0:o_b0 + 1, :]              # (1, 4H)  b_ih0+b_hh0 (g-gate x2)
        whh0 = w_ref[o_whh0:o_whh0 + H, :]        # (H, 4H)
        wih1 = w_ref[o_wih1:o_wih1 + H, :]        # (H, 4H)
        whh1 = w_ref[o_whh1:o_whh1 + H, :]        # (H, 4H)
        b1 = w_ref[o_b1:o_b1 + 1, :]              # (1, 4H)  b_ih1+b_hh1 (g-gate x2)

        # ---- hoisted layer-0 input projection (+ bias) for ALL timesteps ----
        # one well-filled, lane-dense MXU matmul off the serial critical path.
        xproj = jnp.dot(x_ref[...], wih0, preferred_element_type=f32) + b0  # (T*BB,4H)

        # hoisted bias broadcast (JAX does not CSE broadcast_in_dim per iter)
        b1_full = jnp.broadcast_to(b1, (BB, G))

        def gates_to_hc(g, c):
            # Single full-vreg sigmoid (EUP). The cell ("g") gate columns were
            # pre-scaled by 2 in the wrapper, so tanh(x) = 2*sigmoid(2x) - 1 is
            # recovered with one 32-lane VPU FMA instead of a full-vreg tanh.
            sg = jax.nn.sigmoid(g)
            i_g = sg[:, 0 * H:1 * H]
            f_g = sg[:, 1 * H:2 * H]
            g_g = 2.0 * sg[:, 2 * H:3 * H] - 1.0
            o_g = sg[:, 3 * H:4 * H]
            c_new = f_g * c + i_g * g_g
            h_new = o_g * jnp.tanh(c_new)
            return h_new, c_new

        zeros = jnp.zeros((BB, H), f32)
        h0, c0, h1, c1 = zeros, zeros, zeros, zeros

        # ---- fully unrolled 2-layer recurrence (T static & small) ----
        for t in range(T):
            # layer 0: only the recurrent matmul remains on the serial path.
            g0 = xproj[t * BB:(t + 1) * BB, :] + jnp.dot(
                h0, whh0, preferred_element_type=f32)
            h0, c0 = gates_to_hc(g0, c0)
            # layer 1: sum of two dots (no per-step lane concatenate).
            g1 = (jnp.dot(h0, wih1, preferred_element_type=f32)
                  + jnp.dot(h1, whh1, preferred_element_type=f32)
                  + b1_full)
            h1, c1 = gates_to_hc(g1, c1)

        # ---- head: fc1 -> ReLU -> fc2 on the last hidden state ----
        # TODO(synk): nn.Dropout(0.2) treated as identity (inference mode).
        wf1 = w_ref[o_wf1:o_wf1 + H, :]           # (H, 4H) fc1.T, zero-padded 16->4H lanes
        bf1 = w_ref[o_bf1:o_bf1 + 1, :]           # (1, 4H) fc1 bias, zero-padded
        w2r = w_ref[o_w2:o_w2 + 1, :]             # (1, 4H) fc2 weight row, zero-padded
        b2r = w_ref[o_b2:o_b2 + 1, :]             # (1, 4H) fc2 bias replicated on lanes
        z = jnp.maximum(jnp.dot(h1, wf1, preferred_element_type=f32) + bf1, 0.0)
        y = jnp.sum(z * w2r, axis=-1, keepdims=True)            # (BB, 1)
        # lane-dense unmasked store; the wrapper slices column 0.
        out_ref[...] = (jnp.broadcast_to(y, (BB, G)) + b2r).astype(out_ref.dtype)

    return kernel


def init_params(key, input_size, hidden_size=32, num_layers=2):
    """Deterministic synthetic parameters matching nn.LSTM / nn.Linear shapes."""
    assert num_layers == 2
    ks = jax.random.split(key, 12)
    H = hidden_size
    scale = 1.0 / jnp.sqrt(jnp.float32(H))

    def u(k, shape):
        return jax.random.uniform(k, shape, jnp.float32, -scale, scale)

    return dict(
        # layer 0
        w_ih0=u(ks[0], (4 * H, input_size)),
        w_hh0=u(ks[1], (4 * H, H)),
        b_ih0=u(ks[2], (4 * H,)),
        b_hh0=u(ks[3], (4 * H,)),
        # layer 1
        w_ih1=u(ks[4], (4 * H, H)),
        w_hh1=u(ks[5], (4 * H, H)),
        b_ih1=u(ks[6], (4 * H,)),
        b_hh1=u(ks[7], (4 * H,)),
        # head
        w_fc1=u(ks[8], (16, H)),
        b_fc1=u(ks[9], (16,)),
        w_fc2=u(ks[10], (1, 16)),
        b_fc2=u(ks[11], (1,)),
    )


def lstm_speedup_predictor(x, params):
    """x: (B, T, input_size) float32, batch_first like the PyTorch module."""
    B, T, D = x.shape
    H = params["w_hh0"].shape[1]
    G = 4 * H

    # Batch padding; at most 2 batch blocks so both v7x TensorCores can be used
    # for real batches (> one sublane group) without serializing many grid
    # steps on single-TC chips. grid=(1,) at the small test shapes.
    B_pad0 = _round_up(max(B, 8), 8)
    nb = 1 if B_pad0 <= 8 else 2
    bb = _round_up(pl.cdiv(B_pad0, nb), 8)
    B_pad = bb * nb

    # Lane-dense input slab: pad feature dim to a full 128-lane width.
    D_pad = _round_up(D, 128)

    xp = jnp.pad(x.astype(jnp.float32),
                 ((0, B_pad - B), (0, 0), (0, D_pad - D)))        # (B_pad, T, D_pad)
    # time-major, then group into nb batch blocks of bb rows, flattened (T*bb):
    # row t*bb + i of block n is (time t, padded-batch row n*bb + i).
    x_tm = jnp.transpose(xp, (1, 0, 2))                           # (T, B_pad, D_pad)
    x_blk = (x_tm.reshape(T, nb, bb, D_pad)
             .transpose(1, 0, 2, 3)
             .reshape(nb, T * bb, D_pad))                         # (nb, T*bb, D_pad)

    # Pre-scale only the cell ("g") gate columns by 2 so the kernel recovers
    # tanh(x) as 2*sigmoid(2x) - 1 (one sigmoid per cell, no full-vreg tanh).
    gate_scale = jnp.ones((G,), jnp.float32).at[2 * H:3 * H].set(2.0)

    def lstm_w(w):            # (4H, in) -> (in, 4H), g-gate columns scaled
        return w.T * gate_scale

    def lstm_b(b_ih, b_hh):   # combined bias, g-gate lanes scaled
        return ((b_ih + b_hh) * gate_scale).reshape(1, G)

    def head_row(v):          # pad lane dim (16 or 1) -> 4H
        v = v.reshape(1, -1).astype(jnp.float32)
        return jnp.pad(v, ((0, 0), (0, G - v.shape[1])))

    wih0 = jnp.pad(lstm_w(params["w_ih0"]), ((0, D_pad - D), (0, 0)))   # (D_pad, 4H)

    # One contiguous (rows, 4H) parameter slab: LSTM weights/biases + head.
    w_slab, offs = _pack_rows([
        wih0,                                                           # (D_pad, 4H)
        lstm_b(params["b_ih0"], params["b_hh0"]),                       # (1, 4H)
        lstm_w(params["w_hh0"]),                                        # (H, 4H)
        lstm_w(params["w_ih1"]),                                        # (H, 4H)
        lstm_w(params["w_hh1"]),                                        # (H, 4H)
        lstm_b(params["b_ih1"], params["b_hh1"]),                       # (1, 4H)
        jnp.pad(params["w_fc1"].T, ((0, 0), (0, G - 16))),              # (H, 4H)
        head_row(params["b_fc1"]),                                      # (1, 4H)
        head_row(params["w_fc2"]),                                      # (1, 4H)
        jnp.full((1, G), params["b_fc2"][0], jnp.float32),              # (1, 4H)
    ])

    kernel = _make_kernel(T, bb, D_pad, H, offs)
    out = pl.pallas_call(
        kernel,
        out_shape=jax.ShapeDtypeStruct((B_pad, G), jnp.float32),
        grid=(nb,),
        in_specs=[
            pl.BlockSpec((None, T * bb, D_pad), lambda b: (b, 0, 0)),   # x block
            pl.BlockSpec(w_slab.shape, lambda b: (0, 0)),               # full slab
        ],
        out_specs=pl.BlockSpec((bb, G), lambda b: (b, 0)),
        compiler_params=pltpu.CompilerParams(
            dimension_semantics=("parallel",)),
    )(x_blk, w_slab)
    return out[:B, :1]


def _reference(x, params):
    """Pure-JAX reference for correctness checking."""
    B, T, D = x.shape
    H = params["w_hh0"].shape[1]

    def cell(x_t, h, c, w_ih, w_hh, b_ih, b_hh):
        g = x_t @ w_ih.T + h @ w_hh.T + b_ih + b_hh
        i = jax.nn.sigmoid(g[:, 0 * H:1 * H])
        f = jax.nn.sigmoid(g[:, 1 * H:2 * H])
        gg = jnp.tanh(g[:, 2 * H:3 * H])
        o = jax.nn.sigmoid(g[:, 3 * H:4 * H])
        c = f * c + i * gg
        h = o * jnp.tanh(c)
        return h, c

    h0 = c0 = h1 = c1 = jnp.zeros((B, H), jnp.float32)
    for t in range(T):
        h0, c0 = cell(x[:, t, :], h0, c0,
                      params["w_ih0"], params["w_hh0"],
                      params["b_ih0"], params["b_hh0"])
        h1, c1 = cell(h0, h1, c1,
                      params["w_ih1"], params["w_hh1"],
                      params["b_ih1"], params["b_hh1"])
    z = jnp.maximum(h1 @ params["w_fc1"].T + params["b_fc1"], 0.0)
    return z @ params["w_fc2"].T + params["b_fc2"]


if __name__ == "__main__":
    key = jax.random.PRNGKey(0)
    k_x, k_p = jax.random.split(key)

    batch, seq, input_size, hidden = 2, 8, 8, 32
    x = jax.random.normal(k_x, (batch, seq, input_size), jnp.float32)
    params = init_params(k_p, input_size, hidden_size=hidden, num_layers=2)

    out = lstm_speedup_predictor(x, params)
    out = jax.block_until_ready(out)

    ref = _reference(x, params)
    assert out.shape == (batch, 1)
    assert jnp.allclose(out, ref, atol=1e-4, rtol=1e-4), (out, ref)

    print("KERNEL_OK")
</pallas_src>

<mosaic_0001>
module attributes {stable_mosaic.version = 11 : i64} {
  func.func @kernel(%arg0: i32, %arg1: memref<1x64x128xf32, #tpu.memory_space<vmem>>, %arg2: memref<296x128xf32, #tpu.memory_space<vmem>>, %arg3: memref<8x128xf32, #tpu.memory_space<vmem>>) attributes {dimension_semantics = [#tpu.dimension_semantics<parallel>], iteration_bounds = array<i64: 1>, scalar_prefetch = 0 : i64, scratch_operands = 0 : i64, tpu.core_type = #tpu.core_type<tc>, window_params = [{transform_indices = @transform_0, window_bounds = array<i64: 1, 64, 128>}, {pipeline_mode = #tpu.pipeline_mode<synchronous>, transform_indices = @transform_1, window_bounds = array<i64: 296, 128>}, {transform_indices = @transform_2, window_bounds = array<i64: 8, 128>}]} {
    %c0 = arith.constant 0 : index
    %c0_0 = arith.constant 0 : index
    %0 = vector.load %arg2[%c0, %c0_0] : memref<296x128xf32, #tpu.memory_space<vmem>>, vector<128x128xf32>
    %c128 = arith.constant 128 : index
    %c0_1 = arith.constant 0 : index
    %1 = vector.load %arg2[%c128, %c0_1] : memref<296x128xf32, #tpu.memory_space<vmem>>, vector<1x128xf32>
    %c136 = arith.constant 136 : index
    %c0_2 = arith.constant 0 : index
    %2 = vector.load %arg2[%c136, %c0_2] : memref<296x128xf32, #tpu.memory_space<vmem>>, vector<32x128xf32>
    %c168 = arith.constant 168 : index
    %c0_3 = arith.constant 0 : index
    %3 = vector.load %arg2[%c168, %c0_3] : memref<296x128xf32, #tpu.memory_space<vmem>>, vector<32x128xf32>
    %c200 = arith.constant 200 : index
    %c0_4 = arith.constant 0 : index
    %4 = vector.load %arg2[%c200, %c0_4] : memref<296x128xf32, #tpu.memory_space<vmem>>, vector<32x128xf32>
    %c232 = arith.constant 232 : index
    %c0_5 = arith.constant 0 : index
    %5 = vector.load %arg2[%c232, %c0_5] : memref<296x128xf32, #tpu.memory_space<vmem>>, vector<1x128xf32>
    %c0_6 = arith.constant 0 : index
    %c0_7 = arith.constant 0 : index
    %c0_8 = arith.constant 0 : index
    %6 = vector.load %arg1[%c0_6, %c0_7, %c0_8] : memref<1x64x128xf32, #tpu.memory_space<vmem>>, vector<1x64x128xf32>
    %7 = vector.shape_cast %6 : vector<1x64x128xf32> to vector<64x128xf32>
    %cst = arith.constant dense<0.000000e+00> : vector<64x128xf32>
    %8 = tpu.matmul %7, %0, %cst {dimension_numbers = #tpu.dot_dimension_numbers<[1], [0], [0], [1], [0, 0, 1, 1], [], []>} : vector<64x128xf32>, vector<128x128xf32>, vector<64x128xf32> -> vector<64x128xf32>
    %9 = vector.broadcast %1 : vector<1x128xf32> to vector<64x128xf32>
    %10 = arith.addf %8, %9 : vector<64x128xf32>
    %11 = vector.shape_cast %5 : vector<1x128xf32> to vector<1x128xf32>
    %12 = vector.broadcast %11 : vector<1x128xf32> to vector<8x128xf32>
    %cst_9 = arith.constant 0.000000e+00 : f32
    %13 = vector.broadcast %cst_9 : f32 to vector<8x32xf32>
    %14 = vector.extract_strided_slice %10 {offsets = [0, 0], sizes = [8, 128], strides = [1, 1]} : vector<64x128xf32> to vector<8x128xf32>
    %cst_10 = arith.constant dense<0.000000e+00> : vector<8x128xf32>
    %15 = tpu.matmul %13, %2, %cst_10 {dimension_numbers = #tpu.dot_dimension_numbers<[1], [0], [0], [1], [0, 0, 1, 1], [], []>} : vector<8x32xf32>, vector<32x128xf32>, vector<8x128xf32> -> vector<8x128xf32>
    %16 = arith.addf %14, %15 : vector<8x128xf32>
    %17 = arith.negf %16 : vector<8x128xf32>
    %18 = math.exp %17 : vector<8x128xf32>
    %cst_11 = arith.constant 1.000000e+00 : f32
    %19 = vector.broadcast %cst_11 : f32 to vector<8x128xf32>
    %20 = arith.addf %19, %18 : vector<8x128xf32>
    %21 = arith.divf %19, %20 : vector<8x128xf32>
    %22 = vector.extract_strided_slice %21 {offsets = [0, 0], sizes = [8, 32], strides = [1, 1]} : vector<8x128xf32> to vector<8x32xf32>
    %23 = vector.extract_strided_slice %21 {offsets = [0, 32], sizes = [8, 32], strides = [1, 1]} : vector<8x128xf32> to vector<8x32xf32>
    %24 = vector.extract_strided_slice %21 {offsets = [0, 64], sizes = [8, 32], strides = [1, 1]} : vector<8x128xf32> to vector<8x32xf32>
    %cst_12 = arith.constant 2.000000e+00 : f32
    %25 = vector.broadcast %cst_12 : f32 to vector<8x32xf32>
    %26 = arith.mulf %25, %24 : vector<8x32xf32>
    %cst_13 = arith.constant 1.000000e+00 : f32
    %27 = vector.broadcast %cst_13 : f32 to vector<8x32xf32>
    %28 = arith.subf %26, %27 : vector<8x32xf32>
    %29 = vector.extract_strided_slice %21 {offsets = [0, 96], sizes = [8, 32], strides = [1, 1]} : vector<8x128xf32> to vector<8x32xf32>
    %30 = arith.mulf %23, %13 : vector<8x32xf32>
    %31 = arith.mulf %22, %28 : vector<8x32xf32>
    %32 = arith.addf %30, %31 : vector<8x32xf32>
    %33 = math.tanh %32 : vector<8x32xf32>
    %34 = arith.mulf %29, %33 : vector<8x32xf32>
    %cst_14 = arith.constant dense<0.000000e+00> : vector<8x128xf32>
    %35 = tpu.matmul %34, %3, %cst_14 {dimension_numbers = #tpu.dot_dimension_numbers<[1], [0], [0], [1], [0, 0, 1, 1], [], []>} : vector<8x32xf32>, vector<32x128xf32>, vector<8x128xf32> -> vector<8x128xf32>
    %cst_15 = arith.constant dense<0.000000e+00> : vector<8x128xf32>
    %36 = tpu.matmul %13, %4, %cst_15 {dimension_numbers = #tpu.dot_dimension_numbers<[1], [0], [0], [1], [0, 0, 1, 1], [], []>} : vector<8x32xf32>, vector<32x128xf32>, vector<8x128xf32> -> vector<8x128xf32>
    %37 = arith.addf %35, %36 : vector<8x128xf32>
    %38 = arith.addf %37, %12 : vector<8x128xf32>
    %39 = arith.negf %38 : vector<8x128xf32>
    %40 = math.exp %39 : vector<8x128xf32>
    %cst_16 = arith.constant 1.000000e+00 : f32
    %41 = vector.broadcast %cst_16 : f32 to vector<8x128xf32>
    %42 = arith.addf %41, %40 : vector<8x128xf32>
    %43 = arith.divf %41, %42 : vector<8x128xf32>
    %44 = vector.extract_strided_slice %43 {offsets = [0, 0], sizes = [8, 32], strides = [1, 1]} : vector<8x128xf32> to vector<8x32xf32>
    %45 = vector.extract_strided_slice %43 {offsets = [0, 32], sizes = [8, 32], strides = [1, 1]} : vector<8x128xf32> to vector<8x32xf32>
    %46 = vector.extract_strided_slice %43 {offsets = [0, 64], sizes = [8, 32], strides = [1, 1]} : vector<8x128xf32> to vector<8x32xf32>
    %cst_17 = arith.constant 2.000000e+00 : f32
    %47 = vector.broadcast %cst_17 : f32 to vector<8x32xf32>
    %48 = arith.mulf %47, %46 : vector<8x32xf32>
    %cst_18 = arith.constant 1.000000e+00 : f32
    %49 = vector.broadcast %cst_18 : f32 to vector<8x32xf32>
    %50 = arith.subf %48, %49 : vector<8x32xf32>
    %51 = vector.extract_strided_slice %43 {offsets = [0, 96], sizes = [8, 32], strides = [1, 1]} : vector<8x128xf32> to vector<8x32xf32>
    %52 = arith.mulf %45, %13 : vector<8x32xf32>
    %53 = arith.mulf %44, %50 : vector<8x32xf32>
    %54 = arith.addf %52, %53 : vector<8x32xf32>
    %55 = math.tanh %54 : vector<8x32xf32>
    %56 = arith.mulf %51, %55 : vector<8x32xf32>
    %57 = vector.extract_strided_slice %10 {offsets = [8, 0], sizes = [8, 128], strides = [1, 1]} : vector<64x128xf32> to vector<8x128xf32>
    %cst_19 = arith.constant dense<0.000000e+00> : vector<8x128xf32>
    %58 = tpu.matmul %34, %2, %cst_19 {dimension_numbers = #tpu.dot_dimension_numbers<[1], [0], [0], [1], [0, 0, 1, 1], [], []>} : vector<8x32xf32>, vector<32x128xf32>, vector<8x128xf32> -> vector<8x128xf32>
    %59 = arith.addf %57, %58 : vector<8x128xf32>
    %60 = arith.negf %59 : vector<8x128xf32>
    %61 = math.exp %60 : vector<8x128xf32>
    %cst_20 = arith.constant 1.000000e+00 : f32
    %62 = vector.broadcast %cst_20 : f32 to vector<8x128xf32>
    %63 = arith.addf %62, %61 : vector<8x128xf32>
    %64 = arith.divf %62, %63 : vector<8x128xf32>
    %65 = vector.extract_strided_slice %64 {offsets = [0, 0], sizes = [8, 32], strides = [1, 1]} : vector<8x128xf32> to vector<8x32xf32>
    %66 = vector.extract_strided_slice %64 {offsets = [0, 32], sizes = [8, 32], strides = [1, 1]} : vector<8x128xf32> to vector<8x32xf32>
    %67 = vector.extract_strided_slice %64 {offsets = [0, 64], sizes = [8, 32], strides = [1, 1]} : vector<8x128xf32> to vector<8x32xf32>
    %cst_21 = arith.constant 2.000000e+00 : f32
    %68 = vector.broadcast %cst_21 : f32 to vector<8x32xf32>
    %69 = arith.mulf %68, %67 : vector<8x32xf32>
    %cst_22 = arith.constant 1.000000e+00 : f32
    %70 = vector.broadcast %cst_22 : f32 to vector<8x32xf32>
    %71 = arith.subf %69, %70 : vector<8x32xf32>
    %72 = vector.extract_strided_slice %64 {offsets = [0, 96], sizes = [8, 32], strides = [1, 1]} : vector<8x128xf32> to vector<8x32xf32>
    %73 = arith.mulf %66, %32 : vector<8x32xf32>
    %74 = arith.mulf %65, %71 : vector<8x32xf32>
    %75 = arith.addf %73, %74 : vector<8x32xf32>
    %76 = math.tanh %75 : vector<8x32xf32>
    %77 = arith.mulf %72, %76 : vector<8x32xf32>
    %cst_23 = arith.constant dense<0.000000e+00> : vector<8x128xf32>
    %78 = tpu.matmul %77, %3, %cst_23 {dimension_numbers = #tpu.dot_dimension_numbers<[1], [0], [0], [1], [0, 0, 1, 1], [], []>} : vector<8x32xf32>, vector<32x128xf32>, vector<8x128xf32> -> vector<8x128xf32>
    %cst_24 = arith.constant dense<0.000000e+00> : vector<8x128xf32>
    %79 = tpu.matmul %56, %4, %cst_24 {dimension_numbers = #tpu.dot_dimension_numbers<[1], [0], [0], [1], [0, 0, 1, 1], [], []>} : vector<8x32xf32>, vector<32x128xf32>, vector<8x128xf32> -> vector<8x128xf32>
    %80 = arith.addf %78, %79 : vector<8x128xf32>
    %81 = arith.addf %80, %12 : vector<8x128xf32>
    %82 = arith.negf %81 : vector<8x128xf32>
    %83 = math.exp %82 : vector<8x128xf32>
    %cst_25 = arith.constant 1.000000e+00 : f32
    %84 = vector.broadcast %cst_25 : f32 to vector<8x128xf32>
    %85 = arith.addf %84, %83 : vector<8x128xf32>
    %86 = arith.divf %84, %85 : vector<8x128xf32>
    %87 = vector.extract_strided_slice %86 {offsets = [0, 0], sizes = [8, 32], strides = [1, 1]} : vector<8x128xf32> to vector<8x32xf32>
    %88 = vector.extract_strided_slice %86 {offsets = [0, 32], sizes = [8, 32], strides = [1, 1]} : vector<8x128xf32> to vector<8x32xf32>
    %89 = vector.extract_strided_slice %86 {offsets = [0, 64], sizes = [8, 32], strides = [1, 1]} : vector<8x128xf32> to vector<8x32xf32>
    %cst_26 = arith.constant 2.000000e+00 : f32
    %90 = vector.broadcast %cst_26 : f32 to vector<8x32xf32>
    %91 = arith.mulf %90, %89 : vector<8x32xf32>
    %cst_27 = arith.constant 1.000000e+00 : f32
    %92 = vector.broadcast %cst_27 : f32 to vector<8x32xf32>
    %93 = arith.subf %91, %92 : vector<8x32xf32>
    %94 = vector.extract_strided_slice %86 {offsets = [0, 96], sizes = [8, 32], strides = [1, 1]} : vector<8x128xf32> to vector<8x32xf32>
    %95 = arith.mulf %88, %54 : vector<8x32xf32>
    %96 = arith.mulf %87, %93 : vector<8x32xf32>
    %97 = arith.addf %95, %96 : vector<8x32xf32>
    %98 = math.tanh %97 : vector<8x32xf32>
    %99 = arith.mulf %94, %98 : vector<8x32xf32>
    %100 = vector.extract_strided_slice %10 {offsets = [16, 0], sizes = [8, 128], strides = [1, 1]} : vector<64x128xf32> to vector<8x128xf32>
    %cst_28 = arith.constant dense<0.000000e+00> : vector<8x128xf32>
    %101 = tpu.matmul %77, %2, %cst_28 {dimension_numbers = #tpu.dot_dimension_numbers<[1], [0], [0], [1], [0, 0, 1, 1], [], []>} : vector<8x32xf32>, vector<32x128xf32>, vector<8x128xf32> -> vector<8x128xf32>
    %102 = arith.addf %100, %101 : vector<8x128xf32>
    %103 = arith.negf %102 : vector<8x128xf32>
    %104 = math.exp %103 : vector<8x128xf32>
    %cst_29 = arith.constant 1.000000e+00 : f32
    %105 = vector.broadcast %cst_29 : f32 to vector<8x128xf32>
    %106 = arith.addf %105, %104 : vector<8x128xf32>
    %107 = arith.divf %105, %106 : vector<8x128xf32>
    %108 = vector.extract_strided_slice %107 {offsets = [0, 0], sizes = [8, 32], strides = [1, 1]} : vector<8x128xf32> to vector<8x32xf32>
    %109 = vector.extract_strided_slice %107 {offsets = [0, 32], sizes = [8, 32], strides = [1, 1]} : vector<8x128xf32> to vector<8x32xf32>
    %110 = vector.extract_strided_slice %107 {offsets = [0, 64], sizes = [8, 32], strides = [1, 1]} : vector<8x128xf32> to vector<8x32xf32>
    %cst_30 = arith.constant 2.000000e+00 : f32
    %111 = vector.broadcast %cst_30 : f32 to vector<8x32xf32>
    %112 = arith.mulf %111, %110 : vector<8x32xf32>
    %cst_31 = arith.constant 1.000000e+00 : f32
    %113 = vector.broadcast %cst_31 : f32 to vector<8x32xf32>
    %114 = arith.subf %112, %113 : vector<8x32xf32>
    %115 = vector.extract_strided_slice %107 {offsets = [0, 96], sizes = [8, 32], strides = [1, 1]} : vector<8x128xf32> to vector<8x32xf32>
    %116 = arith.mulf %109, %75 : vector<8x32xf32>
    %117 = arith.mulf %108, %114 : vector<8x32xf32>
    %118 = arith.addf %116, %117 : vector<8x32xf32>
    %119 = math.tanh %118 : vector<8x32xf32>
    %120 = arith.mulf %115, %119 : vector<8x32xf32>
    %cst_32 = arith.constant dense<0.000000e+00> : vector<8x128xf32>
    %121 = tpu.matmul %120, %3, %cst_32 {dimension_numbers = #tpu.dot_dimension_numbers<[1], [0], [0], [1], [0, 0, 1, 1], [], []>} : vector<8x32xf32>, vector<32x128xf32>, vector<8x128xf32> -> vector<8x128xf32>
    %cst_33 = arith.constant dense<0.000000e+00> : vector<8x128xf32>
    %122 = tpu.matmul %99, %4, %cst_33 {dimension_numbers = #tpu.dot_dimension_numbers<[1], [0], [0], [1], [0, 0, 1, 1], [], []>} : vector<8x32xf32>, vector<32x128xf32>, vector<8x128xf32> -> vector<8x128xf32>
    %123 = arith.addf %121, %122 : vector<8x128xf32>
    %124 = arith.addf %123, %12 : vector<8x128xf32>
    %125 = arith.negf %124 : vector<8x128xf32>
    %126 = math.exp %125 : vector<8x128xf32>
    %cst_34 = arith.constant 1.000000e+00 : f32
    %127 = vector.broadcast %cst_34 : f32 to vector<8x128xf32>
    %128 = arith.addf %127, %126 : vector<8x128xf32>
    %129 = arith.divf %127, %128 : vector<8x128xf32>
    %130 = vector.extract_strided_slice %129 {offsets = [0, 0], sizes = [8, 32], strides = [1, 1]} : vector<8x128xf32> to vector<8x32xf32>
    %131 = vector.extract_strided_slice %129 {offsets = [0, 32], sizes = [8, 32], strides = [1, 1]} : vector<8x128xf32> to vector<8x32xf32>
    %132 = vector.extract_strided_slice %129 {offsets = [0, 64], sizes = [8, 32], strides = [1, 1]} : vector<8x128xf32> to vector<8x32xf32>
    %cst_35 = arith.constant 2.000000e+00 : f32
    %133 = vector.broadcast %cst_35 : f32 to vector<8x32xf32>
    %134 = arith.mulf %133, %132 : vector<8x32xf32>
    %cst_36 = arith.constant 1.000000e+00 : f32
    %135 = vector.broadcast %cst_36 : f32 to vector<8x32xf32>
    %136 = arith.subf %134, %135 : vector<8x32xf32>
    %137 = vector.extract_strided_slice %129 {offsets = [0, 96], sizes = [8, 32], strides = [1, 1]} : vector<8x128xf32> to vector<8x32xf32>
    %138 = arith.mulf %131, %97 : vector<8x32xf32>
    %139 = arith.mulf %130, %136 : vector<8x32xf32>
    %140 = arith.addf %138, %139 : vector<8x32xf32>
    %141 = math.tanh %140 : vector<8x32xf32>
    %142 = arith.mulf %137, %141 : vector<8x32xf32>
    %143 = vector.extract_strided_slice %10 {offsets = [24, 0], sizes = [8, 128], strides = [1, 1]} : vector<64x128xf32> to vector<8x128xf32>
    %cst_37 = arith.constant dense<0.000000e+00> : vector<8x128xf32>
    %144 = tpu.matmul %120, %2, %cst_37 {dimension_numbers = #tpu.dot_dimension_numbers<[1], [0], [0], [1], [0, 0, 1, 1], [], []>} : vector<8x32xf32>, vector<32x128xf32>, vector<8x128xf32> -> vector<8x128xf32>
    %145 = arith.addf %143, %144 : vector<8x128xf32>
    %146 = arith.negf %145 : vector<8x128xf32>
    %147 = math.exp %146 : vector<8x128xf32>
    %cst_38 = arith.constant 1.000000e+00 : f32
    %148 = vector.broadcast %cst_38 : f32 to vector<8x128xf32>
    %149 = arith.addf %148, %147 : vector<8x128xf32>
    %150 = arith.divf %148, %149 : vector<8x128xf32>
    %151 = vector.extract_strided_slice %150 {offsets = [0, 0], sizes = [8, 32], strides = [1, 1]} : vector<8x128xf32> to vector<8x32xf32>
    %152 = vector.extract_strided_slice %150 {offsets = [0, 32], sizes = [8, 32], strides = [1, 1]} : vector<8x128xf32> to vector<8x32xf32>
    %153 = vector.extract_strided_slice %150 {offsets = [0, 64], sizes = [8, 32], strides = [1, 1]} : vector<8x128xf32> to vector<8x32xf32>
    %cst_39 = arith.constant 2.000000e+00 : f32
    %154 = vector.broadcast %cst_39 : f32 to vector<8x32xf32>
    %155 = arith.mulf %154, %153 : vector<8x32xf32>
    %cst_40 = arith.constant 1.000000e+00 : f32
    %156 = vector.broadcast %cst_40 : f32 to vector<8x32xf32>
    %157 = arith.subf %155, %156 : vector<8x32xf32>
    %158 = vector.extract_strided_slice %150 {offsets = [0, 96], sizes = [8, 32], strides = [1, 1]} : vector<8x128xf32> to vector<8x32xf32>
    %159 = arith.mulf %152, %118 : vector<8x32xf32>
    %160 = arith.mulf %151, %157 : vector<8x32xf32>
    %161 = arith.addf %159, %160 : vector<8x32xf32>
    %162 = math.tanh %161 : vector<8x32xf32>
    %163 = arith.mulf %158, %162 : vector<8x32xf32>
    %cst_41 = arith.constant dense<0.000000e+00> : vector<8x128xf32>
    %164 = tpu.matmul %163, %3, %cst_41 {dimension_numbers = #tpu.dot_dimension_numbers<[1], [0], [0], [1], [0, 0, 1, 1], [], []>} : vector<8x32xf32>, vector<32x128xf32>, vector<8x128xf32> -> vector<8x128xf32>
    %cst_42 = arith.constant dense<0.000000e+00> : vector<8x128xf32>
    %165 = tpu.matmul %142, %4, %cst_42 {dimension_numbers = #tpu.dot_dimension_numbers<[1], [0], [0], [1], [0, 0, 1, 1], [], []>} : vector<8x32xf32>, vector<32x128xf32>, vector<8x128xf32> -> vector<8x128xf32>
    %166 = arith.addf %164, %165 : vector<8x128xf32>
    %167 = arith.addf %166, %12 : vector<8x128xf32>
    %168 = arith.negf %167 : vector<8x128xf32>
    %169 = math.exp %168 : vector<8x128xf32>
    %cst_43 = arith.constant 1.000000e+00 : f32
    %170 = vector.broadcast %cst_43 : f32 to vector<8x128xf32>
    %171 = arith.addf %170, %169 : vector<8x128xf32>
    %172 = arith.divf %170, %171 : vector<8x128xf32>
    %173 = vector.extract_strided_slice %172 {offsets = [0, 0], sizes = [8, 32], strides = [1, 1]} : vector<8x128xf32> to vector<8x32xf32>
    %174 = vector.extract_strided_slice %172 {offsets = [0, 32], sizes = [8, 32], strides = [1, 1]} : vector<8x128xf32> to vector<8x32xf32>
    %175 = vector.extract_strided_slice %172 {offsets = [0, 64], sizes = [8, 32], strides = [1, 1]} : vector<8x128xf32> to vector<8x32xf32>
    %cst_44 = arith.constant 2.000000e+00 : f32
    %176 = vector.broadcast %cst_44 : f32 to vector<8x32xf32>
    %177 = arith.mulf %176, %175 : vector<8x32xf32>
    %cst_45 = arith.constant 1.000000e+00 : f32
    %178 = vector.broadcast %cst_45 : f32 to vector<8x32xf32>
    %179 = arith.subf %177, %178 : vector<8x32xf32>
    %180 = vector.extract_strided_slice %172 {offsets = [0, 96], sizes = [8, 32], strides = [1, 1]} : vector<8x128xf32> to vector<8x32xf32>
    %181 = arith.mulf %174, %140 : vector<8x32xf32>
    %182 = arith.mulf %173, %179 : vector<8x32xf32>
    %183 = arith.addf %181, %182 : vector<8x32xf32>
    %184 = math.tanh %183 : vector<8x32xf32>
    %185 = arith.mulf %180, %184 : vector<8x32xf32>
    %186 = vector.extract_strided_slice %10 {offsets = [32, 0], sizes = [8, 128], strides = [1, 1]} : vector<64x128xf32> to vector<8x128xf32>
    %cst_46 = arith.constant dense<0.000000e+00> : vector<8x128xf32>
    %187 = tpu.matmul %163, %2, %cst_46 {dimension_numbers = #tpu.dot_dimension_numbers<[1], [0], [0], [1], [0, 0, 1, 1], [], []>} : vector<8x32xf32>, vector<32x128xf32>, vector<8x128xf32> -> vector<8x128xf32>
    %188 = arith.addf %186, %187 : vector<8x128xf32>
    %189 = arith.negf %188 : vector<8x128xf32>
    %190 = math.exp %189 : vector<8x128xf32>
    %cst_47 = arith.constant 1.000000e+00 : f32
    %191 = vector.broadcast %cst_47 : f32 to vector<8x128xf32>
    %192 = arith.addf %191, %190 : vector<8x128xf32>
    %193 = arith.divf %191, %192 : vector<8x128xf32>
    %194 = vector.extract_strided_slice %193 {offsets = [0, 0], sizes = [8, 32], strides = [1, 1]} : vector<8x128xf32> to vector<8x32xf32>
    %195 = vector.extract_strided_slice %193 {offsets = [0, 32], sizes = [8, 32], strides = [1, 1]} : vector<8x128xf32> to vector<8x32xf32>
    %196 = vector.extract_strided_slice %193 {offsets = [0, 64], sizes = [8, 32], strides = [1, 1]} : vector<8x128xf32> to vector<8x32xf32>
    %cst_48 = arith.constant 2.000000e+00 : f32
    %197 = vector.broadcast %cst_48 : f32 to vector<8x32xf32>
    %198 = arith.mulf %197, %196 : vector<8x32xf32>
    %cst_49 = arith.constant 1.000000e+00 : f32
    %199 = vector.broadcast %cst_49 : f32 to vector<8x32xf32>
    %200 = arith.subf %198, %199 : vector<8x32xf32>
    %201 = vector.extract_strided_slice %193 {offsets = [0, 96], sizes = [8, 32], strides = [1, 1]} : vector<8x128xf32> to vector<8x32xf32>
    %202 = arith.mulf %195, %161 : vector<8x32xf32>
    %203 = arith.mulf %194, %200 : vector<8x32xf32>
    %204 = arith.addf %202, %203 : vector<8x32xf32>
    %205 = math.tanh %204 : vector<8x32xf32>
    %206 = arith.mulf %201, %205 : vector<8x32xf32>
    %cst_50 = arith.constant dense<0.000000e+00> : vector<8x128xf32>
    %207 = tpu.matmul %206, %3, %cst_50 {dimension_numbers = #tpu.dot_dimension_numbers<[1], [0], [0], [1], [0, 0, 1, 1], [], []>} : vector<8x32xf32>, vector<32x128xf32>, vector<8x128xf32> -> vector<8x128xf32>
    %cst_51 = arith.constant dense<0.000000e+00> : vector<8x128xf32>
    %208 = tpu.matmul %185, %4, %cst_51 {dimension_numbers = #tpu.dot_dimension_numbers<[1], [0], [0], [1], [0, 0, 1, 1], [], []>} : vector<8x32xf32>, vector<32x128xf32>, vector<8x128xf32> -> vector<8x128xf32>
    %209 = arith.addf %207, %208 : vector<8x128xf32>
    %210 = arith.addf %209, %12 : vector<8x128xf32>
    %211 = arith.negf %210 : vector<8x128xf32>
    %212 = math.exp %211 : vector<8x128xf32>
    %cst_52 = arith.constant 1.000000e+00 : f32
    %213 = vector.broadcast %cst_52 : f32 to vector<8x128xf32>
    %214 = arith.addf %213, %212 : vector<8x128xf32>
    %215 = arith.divf %213, %214 : vector<8x128xf32>
    %216 = vector.extract_strided_slice %215 {offsets = [0, 0], sizes = [8, 32], strides = [1, 1]} : vector<8x128xf32> to vector<8x32xf32>
    %217 = vector.extract_strided_slice %215 {offsets = [0, 32], sizes = [8, 32], strides = [1, 1]} : vector<8x128xf32> to vector<8x32xf32>
    %218 = vector.extract_strided_slice %215 {offsets = [0, 64], sizes = [8, 32], strides = [1, 1]} : vector<8x128xf32> to vector<8x32xf32>
    %cst_53 = arith.constant 2.000000e+00 : f32
    %219 = vector.broadcast %cst_53 : f32 to vector<8x32xf32>
    %220 = arith.mulf %219, %218 : vector<8x32xf32>
    %cst_54 = arith.constant 1.000000e+00 : f32
    %221 = vector.broadcast %cst_54 : f32 to vector<8x32xf32>
    %222 = arith.subf %220, %221 : vector<8x32xf32>
    %223 = vector.extract_strided_slice %215 {offsets = [0, 96], sizes = [8, 32], strides = [1, 1]} : vector<8x128xf32> to vector<8x32xf32>
    %224 = arith.mulf %217, %183 : vector<8x32xf32>
    %225 = arith.mulf %216, %222 : vector<8x32xf32>
    %226 = arith.addf %224, %225 : vector<8x32xf32>
    %227 = math.tanh %226 : vector<8x32xf32>
    %228 = arith.mulf %223, %227 : vector<8x32xf32>
    %229 = vector.extract_strided_slice %10 {offsets = [40, 0], sizes = [8, 128], strides = [1, 1]} : vector<64x128xf32> to vector<8x128xf32>
    %cst_55 = arith.constant dense<0.000000e+00> : vector<8x128xf32>
    %230 = tpu.matmul %206, %2, %cst_55 {dimension_numbers = #tpu.dot_dimension_numbers<[1], [0], [0], [1], [0, 0, 1, 1], [], []>} : vector<8x32xf32>, vector<32x128xf32>, vector<8x128xf32> -> vector<8x128xf32>
    %231 = arith.addf %229, %230 : vector<8x128xf32>
    %232 = arith.negf %231 : vector<8x128xf32>
    %233 = math.exp %232 : vector<8x128xf32>
    %cst_56 = arith.constant 1.000000e+00 : f32
    %234 = vector.broadcast %cst_56 : f32 to vector<8x128xf32>
    %235 = arith.addf %234, %233 : vector<8x128xf32>
    %236 = arith.divf %234, %235 : vector<8x128xf32>
    %237 = vector.extract_strided_slice %236 {offsets = [0, 0], sizes = [8, 32], strides = [1, 1]} : vector<8x128xf32> to vector<8x32xf32>
    %238 = vector.extract_strided_slice %236 {offsets = [0, 32], sizes = [8, 32], strides = [1, 1]} : vector<8x128xf32> to vector<8x32xf32>
    %239 = vector.extract_strided_slice %236 {offsets = [0, 64], sizes = [8, 32], strides = [1, 1]} : vector<8x128xf32> to vector<8x32xf32>
    %cst_57 = arith.constant 2.000000e+00 : f32
    %240 = vector.broadcast %cst_57 : f32 to vector<8x32xf32>
    %241 = arith.mulf %240, %239 : vector<8x32xf32>
    %cst_58 = arith.constant 1.000000e+00 : f32
    %242 = vector.broadcast %cst_58 : f32 to vector<8x32xf32>
    %243 = arith.subf %241, %242 : vector<8x32xf32>
    %244 = vector.extract_strided_slice %236 {offsets = [0, 96], sizes = [8, 32], strides = [1, 1]} : vector<8x128xf32> to vector<8x32xf32>
    %245 = arith.mulf %238, %204 : vector<8x32xf32>
    %246 = arith.mulf %237, %243 : vector<8x32xf32>
    %247 = arith.addf %245, %246 : vector<8x32xf32>
    %248 = math.tanh %247 : vector<8x32xf32>
    %249 = arith.mulf %244, %248 : vector<8x32xf32>
    %cst_59 = arith.constant dense<0.000000e+00> : vector<8x128xf32>
    %250 = tpu.matmul %249, %3, %cst_59 {dimension_numbers = #tpu.dot_dimension_numbers<[1], [0], [0], [1], [0, 0, 1, 1], [], []>} : vector<8x32xf32>, vector<32x128xf32>, vector<8x128xf32> -> vector<8x128xf32>
    %cst_60 = arith.constant dense<0.000000e+00> : vector<8x128xf32>
    %251 = tpu.matmul %228, %4, %cst_60 {dimension_numbers = #tpu.dot_dimension_numbers<[1], [0], [0], [1], [0, 0, 1, 1], [], []>} : vector<8x32xf32>, vector<32x128xf32>, vector<8x128xf32> -> vector<8x128xf32>
    %252 = arith.addf %250, %251 : vector<8x128xf32>
    %253 = arith.addf %252, %12 : vector<8x128xf32>
    %254 = arith.negf %253 : vector<8x128xf32>
    %255 = math.exp %254 : vector<8x128xf32>
    %cst_61 = arith.constant 1.000000e+00 : f32
    %256 = vector.broadcast %cst_61 : f32 to vector<8x128xf32>
    %257 = arith.addf %256, %255 : vector<8x128xf32>
    %258 = arith.divf %256, %257 : vector<8x128xf32>
    %259 = vector.extract_strided_slice %258 {offsets = [0, 0], sizes = [8, 32], strides = [1, 1]} : vector<8x128xf32> to vector<8x32xf32>
    %260 = vector.extract_strided_slice %258 {offsets = [0, 32], sizes = [8, 32], strides = [1, 1]} : vector<8x128xf32> to vector<8x32xf32>
    %261 = vector.extract_strided_slice %258 {offsets = [0, 64], sizes = [8, 32], strides = [1, 1]} : vector<8x128xf32> to vector<8x32xf32>
    %cst_62 = arith.constant 2.000000e+00 : f32
    %262 = vector.broadcast %cst_62 : f32 to vector<8x32xf32>
    %263 = arith.mulf %262, %261 : vector<8x32xf32>
    %cst_63 = arith.constant 1.000000e+00 : f32
    %264 = vector.broadcast %cst_63 : f32 to vector<8x32xf32>
    %265 = arith.subf %263, %264 : vector<8x32xf32>
    %266 = vector.extract_strided_slice %258 {offsets = [0, 96], sizes = [8, 32], strides = [1, 1]} : vector<8x128xf32> to vector<8x32xf32>
    %267 = arith.mulf %260, %226 : vector<8x32xf32>
    %268 = arith.mulf %259, %265 : vector<8x32xf32>
    %269 = arith.addf %267, %268 : vector<8x32xf32>
    %270 = math.tanh %269 : vector<8x32xf32>
    %271 = arith.mulf %266, %270 : vector<8x32xf32>
    %272 = vector.extract_strided_slice %10 {offsets = [48, 0], sizes = [8, 128], strides = [1, 1]} : vector<64x128xf32> to vector<8x128xf32>
    %cst_64 = arith.constant dense<0.000000e+00> : vector<8x128xf32>
    %273 = tpu.matmul %249, %2, %cst_64 {dimension_numbers = #tpu.dot_dimension_numbers<[1], [0], [0], [1], [0, 0, 1, 1], [], []>} : vector<8x32xf32>, vector<32x128xf32>, vector<8x128xf32> -> vector<8x128xf32>
    %274 = arith.addf %272, %273 : vector<8x128xf32>
    %275 = arith.negf %274 : vector<8x128xf32>
    %276 = math.exp %275 : vector<8x128xf32>
    %cst_65 = arith.constant 1.000000e+00 : f32
    %277 = vector.broadcast %cst_65 : f32 to vector<8x128xf32>
    %278 = arith.addf %277, %276 : vector<8x128xf32>
    %279 = arith.divf %277, %278 : vector<8x128xf32>
    %280 = vector.extract_strided_slice %279 {offsets = [0, 0], sizes = [8, 32], strides = [1, 1]} : vector<8x128xf32> to vector<8x32xf32>
    %281 = vector.extract_strided_slice %279 {offsets = [0, 32], sizes = [8, 32], strides = [1, 1]} : vector<8x128xf32> to vector<8x32xf32>
    %282 = vector.extract_strided_slice %279 {offsets = [0, 64], sizes = [8, 32], strides = [1, 1]} : vector<8x128xf32> to vector<8x32xf32>
    %cst_66 = arith.constant 2.000000e+00 : f32
    %283 = vector.broadcast %cst_66 : f32 to vector<8x32xf32>
    %284 = arith.mulf %283, %282 : vector<8x32xf32>
    %cst_67 = arith.constant 1.000000e+00 : f32
    %285 = vector.broadcast %cst_67 : f32 to vector<8x32xf32>
    %286 = arith.subf %284, %285 : vector<8x32xf32>
    %287 = vector.extract_strided_slice %279 {offsets = [0, 96], sizes = [8, 32], strides = [1, 1]} : vector<8x128xf32> to vector<8x32xf32>
    %288 = arith.mulf %281, %247 : vector<8x32xf32>
    %289 = arith.mulf %280, %286 : vector<8x32xf32>
    %290 = arith.addf %288, %289 : vector<8x32xf32>
    %291 = math.tanh %290 : vector<8x32xf32>
    %292 = arith.mulf %287, %291 : vector<8x32xf32>
    %cst_68 = arith.constant dense<0.000000e+00> : vector<8x128xf32>
    %293 = tpu.matmul %292, %3, %cst_68 {dimension_numbers = #tpu.dot_dimension_numbers<[1], [0], [0], [1], [0, 0, 1, 1], [], []>} : vector<8x32xf32>, vector<32x128xf32>, vector<8x128xf32> -> vector<8x128xf32>
    %cst_69 = arith.constant dense<0.000000e+00> : vector<8x128xf32>
    %294 = tpu.matmul %271, %4, %cst_69 {dimension_numbers = #tpu.dot_dimension_numbers<[1], [0], [0], [1], [0, 0, 1, 1], [], []>} : vector<8x32xf32>, vector<32x128xf32>, vector<8x128xf32> -> vector<8x128xf32>
    %295 = arith.addf %293, %294 : vector<8x128xf32>
    %296 = arith.addf %295, %12 : vector<8x128xf32>
    %297 = arith.negf %296 : vector<8x128xf32>
    %298 = math.exp %297 : vector<8x128xf32>
    %cst_70 = arith.constant 1.000000e+00 : f32
    %299 = vector.broadcast %cst_70 : f32 to vector<8x128xf32>
    %300 = arith.addf %299, %298 : vector<8x128xf32>
    %301 = arith.divf %299, %300 : vector<8x128xf32>
    %302 = vector.extract_strided_slice %301 {offsets = [0, 0], sizes = [8, 32], strides = [1, 1]} : vector<8x128xf32> to vector<8x32xf32>
    %303 = vector.extract_strided_slice %301 {offsets = [0, 32], sizes = [8, 32], strides = [1, 1]} : vector<8x128xf32> to vector<8x32xf32>
    %304 = vector.extract_strided_slice %301 {offsets = [0, 64], sizes = [8, 32], strides = [1, 1]} : vector<8x128xf32> to vector<8x32xf32>
    %cst_71 = arith.constant 2.000000e+00 : f32
    %305 = vector.broadcast %cst_71 : f32 to vector<8x32xf32>
    %306 = arith.mulf %305, %304 : vector<8x32xf32>
    %cst_72 = arith.constant 1.000000e+00 : f32
    %307 = vector.broadcast %cst_72 : f32 to vector<8x32xf32>
    %308 = arith.subf %306, %307 : vector<8x32xf32>
    %309 = vector.extract_strided_slice %301 {offsets = [0, 96], sizes = [8, 32], strides = [1, 1]} : vector<8x128xf32> to vector<8x32xf32>
    %310 = arith.mulf %303, %269 : vector<8x32xf32>
    %311 = arith.mulf %302, %308 : vector<8x32xf32>
    %312 = arith.addf %310, %311 : vector<8x32xf32>
    %313 = math.tanh %312 : vector<8x32xf32>
    %314 = arith.mulf %309, %313 : vector<8x32xf32>
    %315 = vector.extract_strided_slice %10 {offsets = [56, 0], sizes = [8, 128], strides = [1, 1]} : vector<64x128xf32> to vector<8x128xf32>
    %cst_73 = arith.constant dense<0.000000e+00> : vector<8x128xf32>
    %316 = tpu.matmul %292, %2, %cst_73 {dimension_numbers = #tpu.dot_dimension_numbers<[1], [0], [0], [1], [0, 0, 1, 1], [], []>} : vector<8x32xf32>, vector<32x128xf32>, vector<8x128xf32> -> vector<8x128xf32>
    %317 = arith.addf %315, %316 : vector<8x128xf32>
    %318 = arith.negf %317 : vector<8x128xf32>
    %319 = math.exp %318 : vector<8x128xf32>
    %cst_74 = arith.constant 1.000000e+00 : f32
    %320 = vector.broadcast %cst_74 : f32 to vector<8x128xf32>
    %321 = arith.addf %320, %319 : vector<8x128xf32>
    %322 = arith.divf %320, %321 : vector<8x128xf32>
    %323 = vector.extract_strided_slice %322 {offsets = [0, 0], sizes = [8, 32], strides = [1, 1]} : vector<8x128xf32> to vector<8x32xf32>
    %324 = vector.extract_strided_slice %322 {offsets = [0, 32], sizes = [8, 32], strides = [1, 1]} : vector<8x128xf32> to vector<8x32xf32>
    %325 = vector.extract_strided_slice %322 {offsets = [0, 64], sizes = [8, 32], strides = [1, 1]} : vector<8x128xf32> to vector<8x32xf32>
    %cst_75 = arith.constant 2.000000e+00 : f32
    %326 = vector.broadcast %cst_75 : f32 to vector<8x32xf32>
    %327 = arith.mulf %326, %325 : vector<8x32xf32>
    %cst_76 = arith.constant 1.000000e+00 : f32
    %328 = vector.broadcast %cst_76 : f32 to vector<8x32xf32>
    %329 = arith.subf %327, %328 : vector<8x32xf32>
    %330 = vector.extract_strided_slice %322 {offsets = [0, 96], sizes = [8, 32], strides = [1, 1]} : vector<8x128xf32> to vector<8x32xf32>
    %331 = arith.mulf %324, %290 : vector<8x32xf32>
    %332 = arith.mulf %323, %329 : vector<8x32xf32>
    %333 = arith.addf %331, %332 : vector<8x32xf32>
    %334 = math.tanh %333 : vector<8x32xf32>
    %335 = arith.mulf %330, %334 : vector<8x32xf32>
    %cst_77 = arith.constant dense<0.000000e+00> : vector<8x128xf32>
    %336 = tpu.matmul %335, %3, %cst_77 {dimension_numbers = #tpu.dot_dimension_numbers<[1], [0], [0], [1], [0, 0, 1, 1], [], []>} : vector<8x32xf32>, vector<32x128xf32>, vector<8x128xf32> -> vector<8x128xf32>
    %cst_78 = arith.constant dense<0.000000e+00> : vector<8x128xf32>
    %337 = tpu.matmul %314, %4, %cst_78 {dimension_numbers = #tpu.dot_dimension_numbers<[1], [0], [0], [1], [0, 0, 1, 1], [], []>} : vector<8x32xf32>, vector<32x128xf32>, vector<8x128xf32> -> vector<8x128xf32>
    %338 = arith.addf %336, %337 : vector<8x128xf32>
    %339 = arith.addf %338, %12 : vector<8x128xf32>
    %340 = arith.negf %339 : vector<8x128xf32>
    %341 = math.exp %340 : vector<8x128xf32>
    %cst_79 = arith.constant 1.000000e+00 : f32
    %342 = vector.broadcast %cst_79 : f32 to vector<8x128xf32>
    %343 = arith.addf %342, %341 : vector<8x128xf32>
    %344 = arith.divf %342, %343 : vector<8x128xf32>
    %345 = vector.extract_strided_slice %344 {offsets = [0, 0], sizes = [8, 32], strides = [1, 1]} : vector<8x128xf32> to vector<8x32xf32>
    %346 = vector.extract_strided_slice %344 {offsets = [0, 32], sizes = [8, 32], strides = [1, 1]} : vector<8x128xf32> to vector<8x32xf32>
    %347 = vector.extract_strided_slice %344 {offsets = [0, 64], sizes = [8, 32], strides = [1, 1]} : vector<8x128xf32> to vector<8x32xf32>
    %cst_80 = arith.constant 2.000000e+00 : f32
    %348 = vector.broadcast %cst_80 : f32 to vector<8x32xf32>
    %349 = arith.mulf %348, %347 : vector<8x32xf32>
    %cst_81 = arith.constant 1.000000e+00 : f32
    %350 = vector.broadcast %cst_81 : f32 to vector<8x32xf32>
    %351 = arith.subf %349, %350 : vector<8x32xf32>
    %352 = vector.extract_strided_slice %344 {offsets = [0, 96], sizes = [8, 32], strides = [1, 1]} : vector<8x128xf32> to vector<8x32xf32>
    %353 = arith.mulf %346, %312 : vector<8x32xf32>
    %354 = arith.mulf %345, %351 : vector<8x32xf32>
    %355 = arith.addf %353, %354 : vector<8x32xf32>
    %356 = math.tanh %355 : vector<8x32xf32>
    %357 = arith.mulf %352, %356 : vector<8x32xf32>
    %c240 = arith.constant 240 : index
    %c0_82 = arith.constant 0 : index
    %358 = vector.load %arg2[%c240, %c0_82] : memref<296x128xf32, #tpu.memory_space<vmem>>, vector<32x128xf32>
    %c272 = arith.constant 272 : index
    %c0_83 = arith.constant 0 : index
    %359 = vector.load %arg2[%c272, %c0_83] : memref<296x128xf32, #tpu.memory_space<vmem>>, vector<1x128xf32>
    %c280 = arith.constant 280 : index
    %c0_84 = arith.constant 0 : index
    %360 = vector.load %arg2[%c280, %c0_84] : memref<296x128xf32, #tpu.memory_space<vmem>>, vector<1x128xf32>
    %c288 = arith.constant 288 : index
    %c0_85 = arith.constant 0 : index
    %361 = vector.load %arg2[%c288, %c0_85] : memref<296x128xf32, #tpu.memory_space<vmem>>, vector<1x128xf32>
    %cst_86 = arith.constant dense<0.000000e+00> : vector<8x128xf32>
    %362 = tpu.matmul %357, %358, %cst_86 {dimension_numbers = #tpu.dot_dimension_numbers<[1], [0], [0], [1], [0, 0, 1, 1], [], []>} : vector<8x32xf32>, vector<32x128xf32>, vector<8x128xf32> -> vector<8x128xf32>
    %363 = vector.broadcast %359 : vector<1x128xf32> to vector<8x128xf32>
    %364 = arith.addf %362, %363 : vector<8x128xf32>
    %cst_87 = arith.constant 0.000000e+00 : f32
    %365 = vector.broadcast %cst_87 : f32 to vector<8x128xf32>
    %366 = arith.maximumf %364, %365 : vector<8x128xf32>
    %367 = vector.broadcast %360 : vector<1x128xf32> to vector<8x128xf32>
    %368 = arith.mulf %366, %367 : vector<8x128xf32>
    %cst_88 = arith.constant dense<0.000000e+00> : vector<8xf32>
    %369 = vector.multi_reduction <add>, %368, %cst_88 [1] : vector<8x128xf32> to vector<8xf32>
    %370 = vector.shape_cast %369 : vector<8xf32> to vector<8x1xf32>
    %371 = vector.shape_cast %370 : vector<8x1xf32> to vector<8x1xf32>
    %372 = vector.broadcast %371 : vector<8x1xf32> to vector<8x128xf32>
    %373 = vector.broadcast %361 : vector<1x128xf32> to vector<8x128xf32>
    %374 = arith.addf %372, %373 : vector<8x128xf32>
    %c0_89 = arith.constant 0 : index
    %c0_90 = arith.constant 0 : index
    %375 = vector.load %arg3[%c0_89, %c0_90] : memref<8x128xf32, #tpu.memory_space<vmem>>, vector<8x128xf32>
    tpu.vector_store %arg3[%c0_89, %c0_90], %374 {strides = array<i32>} : memref<8x128xf32, #tpu.memory_space<vmem>>, vector<8x128xf32>,
    return
  }
  func.func @transform_0(%arg0: i32) -> (i32, i32, i32) {
    %c0_i32 = arith.constant 0 : i32
    %c0_i32_0 = arith.constant 0 : i32
    %c0_i32_1 = arith.constant 0 : i32
    return %arg0, %c0_i32, %c0_i32_0 : i32, i32, i32
  }
  func.func @transform_1(%arg0: i32) -> (i32, i32) {
    %c0_i32 = arith.constant 0 : i32
    %c0_i32_0 = arith.constant 0 : i32
    %c0_i32_1 = arith.constant 0 : i32
    return %c0_i32, %c0_i32_0 : i32, i32
  }
  func.func @transform_2(%arg0: i32) -> (i32, i32) {
    %c0_i32 = arith.constant 0 : i32
    %c0_i32_0 = arith.constant 0 : i32
    return %arg0, %c0_i32 : i32, i32
  }
}

</mosaic_0001>

<bundles_post_ra>
// kernel: tpu_custom_call.1
= control target key start
LH: loop header
LB: loop body
LE: loop exit
PB: predicated region body
PF: predicated region fallthrough
CT: control target
= control target key end

     0   :  { %7 = vsyncpa [#allocation3], 0  ;;  %s1924_s0 = inlined_call_operand.hbm [shape: f32[1,64,128], index: 0, kind: input, shape index: {}]   ;;  %s1925_s1 = inlined_call_operand.hbm [shape: f32[296,128], index: 1, kind: input, shape index: {}]   ;;  %s1926_s2 = inlined_call_operand.hbm [shape: f32[8,128], index: 2, kind: output, shape index: {}]  }
   0x1   :  { %8 = vsyncpa [#allocation6], 0 }
   0x2   :  { %9 = vsyncpa [#allocation4], 0  ;;  %s14_s11 = sshll.u32 %s1924_s0, 4  ;;  %s1613_s12 = smov [#allocation2]   ;;  %s15_s11 = int_to_ptr.hbm [resolvable:$true] %s14_s11 }
   0x3   :  { %s16_s13 = sshll.u32 %s1613_s12, 4  ;;  %s27_s16 = sshll.u32 %s1925_s1, 4  ;;  %s17_s13 = int_to_ptr.vmem [resolvable:$true] %s16_s13  ;;  %s28_s16 = int_to_ptr.hbm [resolvable:$true] %s27_s16 }
   0x4   :  { %s1614_s17 = smov 128   ;;  %s1615_s18 = smov 8  }
   0x5   :  { %22 = dma.hbm_to_vmem [thread:$0]  %s15_s11, 1024, %s17_s13, [#allocation3], %s1614_s17, %s1614_s17, %s1615_s18  }
   0x6   :  { %s1616_s19 = smov [#allocation5]  }
   0x7   :  { %s29_s20 = sshll.u32 %s1616_s19, 4  ;;  %s30_s20 = int_to_ptr.vmem [resolvable:$true] %s29_s20 }
   0x8   :  { %35 = dma.hbm_to_vmem [thread:$0]  %s28_s16, 4736, %s30_s20, [#allocation6], %s1614_s17, %s1614_s17, %s1615_s18  }
   0x9   :  { %1607 = dma.done.wait [#allocation3], 1024  }
   0xa   :  { %1608 = vsyncadd [#allocation3], 4294966272 }
   0xb   :  { %1609 = dma.done.wait [#allocation6], 4736  }
   0xc   :  { %1610 = vsyncadd [#allocation6], 4294962560  ;;  %v59_v0 = vld [vmem:[#allocation5 + $0x78] sm:$0xff]  ;;  %v58_v1 = vld [vmem:[#allocation5 + $0x70] sm:$0xff]  ;;  %v1617_v12 = vmov 0.0   ;;  %s1618_s0 = smov 64  }
   0xd   :  { %83 = vmatpush.msra.mxu0 %v59_v0  ;;  %v57_v2 = vld [vmem:[#allocation5 + $0x68] sm:$0xff]  ;;  %v56_v3 = vld [vmem:[#allocation5 + $0x60] sm:$0xff]  ;;  %v1645_v5 = vld [vmem:[#allocation5 + $0x98] sm:$0xff]  ;;  %s1619_s1 = smov 32   ;;  %vm125_vm4 = vcmask 261120   ;;  %s1620_s21 = smov [#allocation7]  }
   0xe   :  { %v1642_v4 = vld [vmem:[#allocation5 + $0xa0] sm:$0xff]  ;;  %v55_v6 = vld [vmem:[#allocation5 + $0x58] sm:$0xff]  ;;  %v54_v7 = vld [vmem:[#allocation5 + $0x50] sm:$0xff]  ;;  %s1354_s22 = sshll.u32 %s1620_s21, 4  ;;  %s1356_s25 = sshll.u32 %s1926_s2, 4  ;;  %s1355_s22 = int_to_ptr.vmem [resolvable:$true] %s1354_s22  ;;  %s1357_s25 = int_to_ptr.hbm [resolvable:$true] %s1356_s25 }
   0xf   :  { %84 = vmatpush.msra.mxu0 %v58_v1  ;;  %141 = vmatpush.msra.mxu1 %v1642_v4  ;;  %v1647_v8 = vld [vmem:[#allocation5 + $0x90] sm:$0xff]  ;;  %v1650_v9 = vld [vmem:[#allocation5 + $0x88] sm:$0xff]  ;;  %v52_v11 = vld [vmem:[#allocation5 + $0x40] sm:$0xff] }
  0x10   :  { %v53_v10 = vld [vmem:[#allocation5 + $0x48] sm:$0xff]  ;;  %v51_v13 = vld [vmem:[#allocation5 + $0x38] sm:$0xff]  ;;  %v50_v14 = vld [vmem:[#allocation5 + $0x30] sm:$0xff] }
  0x11   :  { %85 = vmatpush.msra.mxu0 %v57_v2  ;;  %142 = vmatpush.msra.mxu1 %v1645_v5  ;;  %v49_v15 = vld [vmem:[#allocation5 + $0x28] sm:$0xff]  ;;  %v48_v16 = vld [vmem:[#allocation5 + $0x20] sm:$0xff]  ;;  %v47_v17 = vld [vmem:[#allocation5 + $0x18] sm:$0xff] }
  0x12   :  { %v46_v18 = vld [vmem:[#allocation5 + $0x10] sm:$0xff]  ;;  %v45_v19 = vld [vmem:[#allocation5 + $0x8] sm:$0xff]  ;;  %v44_v20 = vld [vmem:[#allocation5] sm:$0xff] }
  0x13   :  { %86 = vmatpush.msra.mxu0 %v56_v3  ;;  %143 = vmatpush.msra.mxu1 %v1647_v8  ;;  %v74_v21 = vld [vmem:[#allocation2] sm:$0xff]  ;;  %v1676_v50 = vld [vmem:[#allocation5 + $0xd8] sm:$0xff]  ;;  %v1682_v52 = vld [vmem:[#allocation5 + $0xd0] sm:$0xff] }
  0x14   :  { %v1663_v22 = vld [vmem:[#allocation5 + $0x80] ss:$0 sm:$0xff]  ;;  %v1680_v51 = vld [vmem:[#allocation5 + $0xb8] sm:$0xff]  ;;  %v1684_v53 = vld [vmem:[#allocation5 + $0xb0] sm:$0xff] }
  0x15   :  { %87 = vmatpush.msra.mxu0 %v55_v6  ;;  %144 = vmatpush.msra.mxu1 %v1650_v9  ;;  %v1672_v48 = vld [vmem:[#allocation5 + $0xe0] sm:$0xff]  ;;  %v75_v54 = vld [vmem:[#allocation2 + $0x8] sm:$0xff] }
  0x16   :  { %145 = vmatmul.f32.vlgmr.msra.gmra.mxu1 %v1617_v12  ;;  %v1674_v49 = vld [vmem:[#allocation5 + $0xc0] sm:$0xff]  ;;  %200 = vmatpush.msra.mxu2 %v1672_v48  ;;  %v1688_v55 = vld [vmem:[#allocation5 + $0xc8] sm:$0xff] }
  0x17   :  { %88 = vmatpush.msra.mxu0 %v54_v7  ;;  %284 = vmatpush.msrb.mxu1 %v1642_v4  ;;  %v1690_v56 = vld [vmem:[#allocation5 + $0xa8] sm:$0xff] }
  0x18   :  { %225 = vmatpush.msra.mxu3 %v1674_v49  ;;  %201 = vmatpush.msra.mxu2 %v1676_v50  ;;  %v1721_v2 = vld [vmem:[#allocation5 + $0xe8] ss:$0 sm:$0xff] }
  0x19   :  { %89 = vmatpush.msra.mxu0 %v53_v10  ;;  %285 = vmatpush.msrb.mxu1 %v1645_v5 }
  0x1a   :  { %226 = vmatpush.msra.mxu3 %v1680_v51  ;;  %202 = vmatpush.msra.mxu2 %v1682_v52 }
  0x1b   :  { %90 = vmatpush.msra.mxu0 %v52_v11  ;;  %286 = vmatpush.msrb.mxu1 %v1647_v8 }
  0x1c   :  { %227 = vmatpush.msra.mxu3 %v1684_v53  ;;  %203 = vmatpush.msra.mxu2 %v1688_v55 }
  0x1d   :  { %91 = vmatpush.msra.mxu0 %v51_v13  ;;  %287 = vmatpush.msrb.mxu1 %v1650_v9 }
  0x1e   :  { %228 = vmatpush.msra.mxu3 %v1690_v56  ;;  %204 = vmatmul.f32.vlgmr.msra.gmra.mxu2 %v1617_v12 }
  0x1f   :  { %92 = vmatpush.msra.mxu0 %v50_v14  ;;  %432 = vmatpush.msra.mxu1 %v1642_v4 }
  0x20   :  { %373 = vmatpush.msrb.mxu3 %v1674_v49  ;;  %348 = vmatpush.msrb.mxu2 %v1672_v48 }
  0x21   :  { %93 = vmatpush.msra.mxu0 %v49_v15  ;;  %433 = vmatpush.msra.mxu1 %v1645_v5 }
  0x22   :  { %374 = vmatpush.msrb.mxu3 %v1680_v51  ;;  %349 = vmatpush.msrb.mxu2 %v1676_v50 }
  0x23   :  { %94 = vmatpush.msra.mxu0 %v48_v16  ;;  %434 = vmatpush.msra.mxu1 %v1647_v8 }
  0x24   :  { %375 = vmatpush.msrb.mxu3 %v1684_v53  ;;  %350 = vmatpush.msrb.mxu2 %v1682_v52 }
  0x25   :  { %95 = vmatpush.msra.mxu0 %v47_v17  ;;  %435 = vmatpush.msra.mxu1 %v1650_v9 }
  0x26   :  { %376 = vmatpush.msrb.mxu3 %v1690_v56  ;;  %351 = vmatpush.msrb.mxu2 %v1688_v55 }
  0x27   :  { %96 = vmatpush.msra.mxu0 %v46_v18 }
  0x28   :  { %496 = vmatpush.msra.mxu2 %v1672_v48 }
  0x29   :  { %97 = vmatpush.msra.mxu0 %v45_v19 }
  0x2a   :  { %497 = vmatpush.msra.mxu2 %v1676_v50 }
  0x2b   :  { %98 = vmatpush.msra.mxu0 %v44_v20 }
  0x2c   :  { %99 = vmatmul.f32.vlgmr.msra.gmra.mxu0 %v74_v21  ;;  %498 = vmatpush.msra.mxu2 %v1682_v52 }
  0x2e   :  { %499 = vmatpush.msra.mxu2 %v1688_v55 }
  0x34   :  { %102 = vmatmul.f32.gmra.mxu0 %v75_v54 }
  0x93   :  { %v146_v24 = vpop.f32.mrf.mxu1 }
  0xa1   :  { %v205_v1 = vpop.f32.mrf.mxu2 }
  0xa9   :  { %v100_v23 = vpop.f32.mrf.mxu0 }
  0xaa   :  { %v101_v25 = vadd.f32 %v1663_v22, %v100_v23 }
  0xac   :  { %v149_v26 = vadd.f32 %v146_v24, %v101_v25 }
  0xae   :  { %v1367_v27 = vmul.f32 -1.442695, %v149_v26 }
  0xb0   :  { %1435 = vpow2.f32 %v1367_v27 }
  0xb1   :  { %v103_v60 = vpop.f32.mrf.mxu0 }
  0xb2   :  { %v104_v61 = vadd.f32 %v1663_v22, %v103_v60 }
  0xb6   :  { %v1436_v28 = vpop.eup %1435 }
  0xb7   :  { %v153_v29 = vadd.f32 1.0, %v1436_v28 }
  0xb9   :  { %1437 = vrcp.f32 %v153_v29  ;;  %v165_v33 = vand.u32 2147483648, %v153_v29  ;;  %v163_v35 = vand.u32 2147483647, %v153_v29  ;;  %vm159_vm1 = vweird.f32 %v153_v29 }
  0xbb   :  { %v166_v37 = vor.u32 1.1754944e-38, %v165_v33  ;;  %vm164_vm3 = vcmp.eq.f32.partialorder %v163_v35, 8.507059e+37 }
  0xbf   :  { %v1438_v30 = vpop.eup %1437 }
  0xc0   :  { %v155_v31 = vmul.f32 %v1438_v30, %v153_v29  ;;  %vm160_vm0 = vweird.f32 %v1438_v30 }
  0xc1   :  { %vm161_vm2 = vmor %vm159_vm1, %vm160_vm0 }
  0xc2   :  { %v156_v32 = vsub.f32 1.0, %v155_v31 }
  0xc4   :  { %v157_v34 = vmul.f32 %v1438_v30, %v156_v32 }
  0xc6   :  { %v158_v36 = vadd.f32 %v1438_v30, %v157_v34 }
  0xc8   :  { %v162_v38 = vsel %vm161_vm2, %v1438_v30, %v158_v36 }
  0xc9   :  { %v167_v39 = vsel %vm164_vm3, %v166_v37, %v162_v38 }
  0xca   :  { %v169_v40 = vmul.f32 2.0, %v167_v39  ;;  %v171_v44 = vmul.f32 0.0, %v167_v39 }
  0xcc   :  { %v1368_v41 = vadd.f32 -1.0, %v169_v40 }
  0xce   :  { %173 = vrot.lane.b32.xlu0 %v1368_v41, %s1618_s0 }
 0x140   :  { %v174_v42 = vpop.permute.xlu0 %173 }
 0x141   :  { %v176_v43 = vmul.f32 %v174_v42, %v167_v39 }
 0x143   :  { %178 = vrot.lane.b32.xlu0 %v176_v43, %s1619_s1 }
 0x1b5   :  { %v179_v45 = vpop.permute.xlu0 %178 }
 0x1b6   :  { %v1668_v46 = vadd.f32 %v179_v45, %v171_v44 }
 0x1b8   :  { %1439 = vtanh.f32 %v1668_v46 }
 0x1be   :  { %v1440_v47 = vpop.eup %1439 }
 0x1bf   :  { %184 = vrot.lane.b32.xlu1 %v1440_v47, %s1618_s0 }
 0x231   :  { %v185_v57 = vpop.permute.xlu1 %184 }
 0x232   :  { %v187_v58 = vmul.f32 %v185_v57, %v167_v39 }
 0x234   :  { %209 = vrot.lane.b32.xlu1 %v187_v58, %s1619_s1 }
 0x2a6   :  { %v210_v59 = vpop.permute.xlu1 %209 }
 0x2a7   :  { %1369 = vmatmul.msk.f32.vlgmr.msra.gmra.mxu3 %vm125_vm4, %v210_v59  ;;  %1372 = vmatmul.msk.f32.vlgmr.msrb.gmra.mxu1 %vm125_vm4, %v210_v59 }
 0x2a8   :  { %580 = vmatpush.msrb.mxu1 %v1642_v4  ;;  %521 = vmatpush.msra.mxu3 %v1674_v49 }
 0x2aa   :  { %581 = vmatpush.msrb.mxu1 %v1645_v5  ;;  %522 = vmatpush.msra.mxu3 %v1680_v51 }
 0x2ac   :  { %582 = vmatpush.msrb.mxu1 %v1647_v8  ;;  %523 = vmatpush.msra.mxu3 %v1684_v53 }
 0x2ae   :  { %583 = vmatpush.msrb.mxu1 %v1650_v9  ;;  %524 = vmatpush.msra.mxu3 %v1690_v56 }
 0x324   :  { %v289_v62 = vpop.f32.mrf.mxu1 }
 0x325   :  { %v292_v63 = vadd.f32 %v289_v62, %v104_v61 }
 0x327   :  { %v1373_v0 = vmul.f32 -1.442695, %v292_v63 }
 0x329   :  { %1441 = vpow2.f32 %v1373_v0 }
 0x32a   :  { %v230_v3 = vpop.f32.mrf.mxu3 }
 0x32b   :  { %v231_v6 = vadd.f32 %v230_v3, %v205_v1 }
 0x32d   :  { %v233_v7 = vadd.f32 %v1721_v2, %v231_v6 }
 0x32f   :  { %v1442_v10 = vpop.eup %1441  ;;  %v1370_v11 = vmul.f32 -1.442695, %v233_v7 }
 0x330   :  { %v296_v12 = vadd.f32 1.0, %v1442_v10 }
 0x331   :  { %1443 = vpow2.f32 %v1370_v11 }
 0x332   :  { %1445 = vrcp.f32 %v296_v12  ;;  %v308_v29 = vand.u32 2147483648, %v296_v12  ;;  %vm302_vm10 = vweird.f32 %v296_v12  ;;  %v306_v31 = vand.u32 2147483647, %v296_v12 }
 0x334   :  { %v309_v35 = vor.u32 1.1754944e-38, %v308_v29  ;;  %vm307_vm12 = vcmp.eq.f32.partialorder %v306_v31, 8.507059e+37 }
 0x337   :  { %v1444_v13 = vpop.eup %1443 }
 0x338   :  { %v1446_v14 = vpop.eup %1445  ;;  %v237_v15 = vadd.f32 1.0, %v1444_v13 }
 0x339   :  { %v298_v16 = vmul.f32 %v1446_v14, %v296_v12  ;;  %vm303_vm7 = vweird.f32 %v1446_v14 }
 0x33a   :  { %1447 = vrcp.f32 %v237_v15  ;;  %v249_v23 = vand.u32 2147483648, %v237_v15  ;;  %v247_v25 = vand.u32 2147483647, %v237_v15  ;;  %vm243_vm6 = vweird.f32 %v237_v15  ;;  %vm304_vm11 = vmor %vm302_vm10, %vm303_vm7 }
 0x33b   :  { %v299_v17 = vsub.f32 1.0, %v298_v16 }
 0x33c   :  { %v250_v28 = vor.u32 1.1754944e-38, %v249_v23  ;;  %vm248_vm9 = vcmp.eq.f32.partialorder %v247_v25, 8.507059e+37 }
 0x33d   :  { %v300_v21 = vmul.f32 %v1446_v14, %v299_v17 }
 0x33f   :  { %v301_v27 = vadd.f32 %v1446_v14, %v300_v21 }
 0x340   :  { %v1448_v18 = vpop.eup %1447 }
 0x341   :  { %v239_v19 = vmul.f32 %v1448_v18, %v237_v15  ;;  %vm244_vm5 = vweird.f32 %v1448_v18  ;;  %v305_v34 = vsel %vm304_vm11, %v1446_v14, %v301_v27 }
 0x342   :  { %vm245_vm8 = vmor %vm243_vm6, %vm244_vm5  ;;  %v310_v37 = vsel %vm307_vm12, %v309_v35, %v305_v34 }
 0x343   :  { %v240_v20 = vsub.f32 1.0, %v239_v19  ;;  %v312_v38 = vmul.f32 2.0, %v310_v37  ;;  %v314_v54 = vmul.f32 %v310_v37, %v1668_v46  ;;  %v76_v46 = vld [vmem:[#allocation2 + $0x10] sm:$0xff] }
 0x344   :  { %105 = vmatmul.f32.gmra.mxu0 %v76_v46 }
 0x345   :  { %v241_v24 = vmul.f32 %v1448_v18, %v240_v20  ;;  %v1374_v39 = vadd.f32 -1.0, %v312_v38 }
 0x347   :  { %v242_v26 = vadd.f32 %v1448_v18, %v241_v24 }
 0x349   :  { %v246_v30 = vsel %vm245_vm8, %v1448_v18, %v242_v26 }
 0x34a   :  { %v251_v32 = vsel %vm248_vm9, %v250_v28, %v246_v30 }
 0x34b   :  { %v253_v33 = vmul.f32 2.0, %v251_v32  ;;  %v255_v44 = vmul.f32 0.0, %v251_v32 }
 0x34d   :  { %v1371_v36 = vadd.f32 -1.0, %v253_v33 }
 0x34f   :  { %257 = vrot.lane.b32.xlu2 %v1371_v36, %s1618_s0 }
 0x357   :  { %316 = vrot.lane.b32.xlu2 %v1374_v39, %s1618_s0 }
 0x3a9   :  { %v258_v40 = vpop.permute.xlu2 %257 }
 0x3aa   :  { %v260_v41 = vmul.f32 %v258_v40, %v251_v32 }
 0x3ac   :  { %262 = vrot.lane.b32.xlu0 %v260_v41, %s1619_s1 }
 0x3b1   :  { %v317_v42 = vpop.permute.xlu2 %316 }
 0x3b2   :  { %v319_v43 = vmul.f32 %v317_v42, %v310_v37 }
 0x3b4   :  { %321 = vrot.lane.b32.xlu1 %v319_v43, %s1619_s1 }
 0x3c1   :  { %v106_v6 = vpop.f32.mrf.mxu0 }
 0x3c2   :  { %v107_v7 = vadd.f32 %v1663_v22, %v106_v6 }
 0x41e   :  { %v263_v45 = vpop.permute.xlu0 %262 }
 0x41f   :  { %v1728_v47 = vadd.f32 %v263_v45, %v255_v44 }
 0x421   :  { %1449 = vtanh.f32 %v1728_v47 }
 0x426   :  { %v322_v57 = vpop.permute.xlu1 %321 }
 0x427   :  { %v1450_v58 = vpop.eup %1449  ;;  %v1732_v59 = vadd.f32 %v322_v57, %v314_v54 }
 0x428   :  { %268 = vrot.lane.b32.xlu2 %v1450_v58, %s1618_s0 }
 0x429   :  { %1451 = vtanh.f32 %v1732_v59 }
 0x42f   :  { %v1452_v60 = vpop.eup %1451 }
 0x430   :  { %327 = vrot.lane.b32.xlu0 %v1452_v60, %s1618_s0 }
 0x482   :  { %v269_v61 = vpop.permute.xlu2 %268 }
 0x483   :  { %v271_v62 = vmul.f32 %v269_v61, %v251_v32 }
 0x485   :  { %332 = vrot.lane.b32.xlu1 %v271_v62, %s1619_s1 }
 0x4a2   :  { %v328_v63 = vpop.permute.xlu0 %327 }
 0x4a3   :  { %v330_v0 = vmul.f32 %v328_v63, %v310_v37 }
 0x4a5   :  { %357 = vrot.lane.b32.xlu2 %v330_v0, %s1619_s1 }
 0x4f7   :  { %v333_v1 = vpop.permute.xlu1 %332 }
 0x4f8   :  { %1375 = vmatmul.msk.f32.vlgmr.msrb.gmra.mxu2 %vm125_vm4, %v333_v1 }
 0x4f9   :  { %644 = vmatpush.msrb.mxu2 %v1672_v48 }
 0x4fb   :  { %645 = vmatpush.msrb.mxu2 %v1676_v50 }
 0x4fd   :  { %646 = vmatpush.msrb.mxu2 %v1682_v52 }
 0x4ff   :  { %v358_v3 = vpop.permute.xlu2 %357  ;;  %647 = vmatpush.msrb.mxu2 %v1688_v55 }
 0x500   :  { %1376 = vmatmul.msk.f32.vlgmr.msrb.gmra.mxu3 %vm125_vm4, %v358_v3  ;;  %1379 = vmatmul.msk.f32.vlgmr.msra.gmra.mxu1 %vm125_vm4, %v358_v3 }
 0x501   :  { %669 = vmatpush.msrb.mxu3 %v1674_v49  ;;  %728 = vmatpush.msra.mxu1 %v1642_v4 }
 0x503   :  { %670 = vmatpush.msrb.mxu3 %v1680_v51  ;;  %729 = vmatpush.msra.mxu1 %v1645_v5 }
 0x505   :  { %671 = vmatpush.msrb.mxu3 %v1684_v53  ;;  %730 = vmatpush.msra.mxu1 %v1647_v8 }
 0x507   :  { %672 = vmatpush.msrb.mxu3 %v1690_v56  ;;  %731 = vmatpush.msra.mxu1 %v1650_v9 }
 0x57b   :  { %v353_v13 = vpop.f32.mrf.mxu2 }
 0x57d   :  { %v437_v10 = vpop.f32.mrf.mxu1 }
 0x57e   :  { %v440_v11 = vadd.f32 %v437_v10, %v107_v7  ;;  %v77_v10 = vld [vmem:[#allocation2 + $0x18] sm:$0xff] }
 0x57f   :  { %108 = vmatmul.f32.gmra.mxu0 %v77_v10 }
 0x580   :  { %v1380_v12 = vmul.f32 -1.442695, %v440_v11 }
 0x582   :  { %1453 = vpow2.f32 %v1380_v12 }
 0x583   :  { %v378_v14 = vpop.f32.mrf.mxu3 }
 0x584   :  { %v379_v15 = vadd.f32 %v378_v14, %v353_v13 }
 0x586   :  { %v381_v16 = vadd.f32 %v1721_v2, %v379_v15 }
 0x588   :  { %v1454_v17 = vpop.eup %1453  ;;  %v1377_v18 = vmul.f32 -1.442695, %v381_v16 }
 0x589   :  { %v444_v19 = vadd.f32 1.0, %v1454_v17 }
 0x58a   :  { %1455 = vpow2.f32 %v1377_v18 }
 0x58b   :  { %1457 = vrcp.f32 %v444_v19  ;;  %v456_v26 = vand.u32 2147483648, %v444_v19  ;;  %v454_v28 = vand.u32 2147483647, %v444_v19  ;;  %vm450_vm14 = vweird.f32 %v444_v19 }
 0x58d   :  { %v457_v31 = vor.u32 1.1754944e-38, %v456_v26  ;;  %vm455_vm0 = vcmp.eq.f32.partialorder %v454_v28, 8.507059e+37 }
 0x590   :  { %v1456_v20 = vpop.eup %1455 }
 0x591   :  { %v1458_v21 = vpop.eup %1457  ;;  %v385_v23 = vadd.f32 1.0, %v1456_v20 }
 0x592   :  { %v446_v24 = vmul.f32 %v1458_v21, %v444_v19  ;;  %vm451_vm13 = vweird.f32 %v1458_v21 }
 0x593   :  { %1459 = vrcp.f32 %v385_v23  ;;  %vm452_vm15 = vmor %vm450_vm14, %vm451_vm13  ;;  %v397_v37 = vand.u32 2147483648, %v385_v23  ;;  %v395_v40 = vand.u32 2147483647, %v385_v23  ;;  %vm391_vm2 = vweird.f32 %v385_v23 }
 0x594   :  { %v447_v25 = vsub.f32 1.0, %v446_v24 }
 0x595   :  { %v398_v42 = vor.u32 1.1754944e-38, %v397_v37  ;;  %vm396_vm5 = vcmp.eq.f32.partialorder %v395_v40, 8.507059e+37 }
 0x596   :  { %v448_v27 = vmul.f32 %v1458_v21, %v447_v25 }
 0x598   :  { %v449_v29 = vadd.f32 %v1458_v21, %v448_v27 }
 0x599   :  { %v1460_v30 = vpop.eup %1459 }
 0x59a   :  { %v387_v32 = vmul.f32 %v1460_v30, %v385_v23  ;;  %v453_v33 = vsel %vm452_vm15, %v1458_v21, %v449_v29  ;;  %vm392_vm1 = vweird.f32 %v1460_v30 }
 0x59b   :  { %v458_v34 = vsel %vm455_vm0, %v457_v31, %v453_v33  ;;  %vm393_vm3 = vmor %vm391_vm2, %vm392_vm1 }
 0x59c   :  { %v388_v35 = vsub.f32 1.0, %v387_v32  ;;  %v460_v36 = vmul.f32 2.0, %v458_v34  ;;  %v462_v1 = vmul.f32 %v458_v34, %v1732_v59 }
 0x59e   :  { %v1381_v38 = vadd.f32 -1.0, %v460_v36  ;;  %v389_v39 = vmul.f32 %v1460_v30, %v388_v35 }
 0x5a0   :  { %464 = vrot.lane.b32.xlu1 %v1381_v38, %s1618_s0  ;;  %v390_v41 = vadd.f32 %v1460_v30, %v389_v39 }
 0x5a2   :  { %v394_v43 = vsel %vm393_vm3, %v1460_v30, %v390_v41 }
 0x5a3   :  { %v399_v44 = vsel %vm396_vm5, %v398_v42, %v394_v43 }
 0x5a4   :  { %v401_v45 = vmul.f32 2.0, %v399_v44  ;;  %v403_v62 = vmul.f32 %v399_v44, %v1728_v47 }
 0x5a6   :  { %v1378_v54 = vadd.f32 -1.0, %v401_v45 }
 0x5a8   :  { %405 = vrot.lane.b32.xlu0 %v1378_v54, %s1618_s0 }
 0x5fc   :  { %v109_v15 = vpop.f32.mrf.mxu0 }
 0x5fd   :  { %v110_v16 = vadd.f32 %v1663_v22, %v109_v15 }
 0x612   :  { %v465_v57 = vpop.permute.xlu1 %464 }
 0x613   :  { %v467_v58 = vmul.f32 %v465_v57, %v458_v34 }
 0x615   :  { %469 = vrot.lane.b32.xlu0 %v467_v58, %s1619_s1 }
 0x61a   :  { %v406_v60 = vpop.permute.xlu0 %405 }
 0x61b   :  { %v408_v61 = vmul.f32 %v406_v60, %v399_v44 }
 0x61d   :  { %410 = vrot.lane.b32.xlu2 %v408_v61, %s1619_s1 }
 0x677   :  { %v411_v63 = vpop.permute.xlu2 %410 }
 0x678   :  { %v1761_v0 = vadd.f32 %v411_v63, %v403_v62 }
 0x67a   :  { %1461 = vtanh.f32 %v1761_v0 }
 0x680   :  { %v1462_v46 = vpop.eup %1461 }
 0x681   :  { %416 = vrot.lane.b32.xlu1 %v1462_v46, %s1618_s0 }
 0x687   :  { %v470_v3 = vpop.permute.xlu0 %469 }
 0x688   :  { %v1766_v6 = vadd.f32 %v470_v3, %v462_v1 }
 0x68a   :  { %1463 = vtanh.f32 %v1766_v6 }
 0x690   :  { %v1464_v7 = vpop.eup %1463 }
 0x691   :  { %475 = vrot.lane.b32.xlu2 %v1464_v7, %s1618_s0 }
 0x6eb   :  { %v476_v47 = vpop.permute.xlu2 %475 }
 0x6ec   :  { %v478_v11 = vmul.f32 %v476_v47, %v458_v34 }
 0x6ee   :  { %505 = vrot.lane.b32.xlu1 %v478_v11, %s1619_s1 }
 0x6f3   :  { %v417_v12 = vpop.permute.xlu1 %416 }
 0x6f4   :  { %v419_v13 = vmul.f32 %v417_v12, %v399_v44 }
 0x6f6   :  { %480 = vrot.lane.b32.xlu0 %v419_v13, %s1619_s1 }
 0x760   :  { %v506_v14 = vpop.permute.xlu1 %505 }
 0x761   :  { %1383 = vmatmul.msk.f32.vlgmr.msra.gmra.mxu3 %vm125_vm4, %v506_v14  ;;  %1386 = vmatmul.msk.f32.vlgmr.msrb.gmra.mxu1 %vm125_vm4, %v506_v14 }
 0x762   :  { %817 = vmatpush.msra.mxu3 %v1674_v49  ;;  %876 = vmatpush.msrb.mxu1 %v1642_v4 }
 0x764   :  { %818 = vmatpush.msra.mxu3 %v1680_v51  ;;  %877 = vmatpush.msrb.mxu1 %v1645_v5 }
 0x766   :  { %819 = vmatpush.msra.mxu3 %v1684_v53  ;;  %878 = vmatpush.msrb.mxu1 %v1647_v8 }
 0x768   :  { %v481_v59 = vpop.permute.xlu0 %480  ;;  %820 = vmatpush.msra.mxu3 %v1690_v56  ;;  %879 = vmatpush.msrb.mxu1 %v1650_v9 }
 0x769   :  { %1382 = vmatmul.msk.f32.vlgmr.msra.gmra.mxu2 %vm125_vm4, %v481_v59 }
 0x76a   :  { %792 = vmatpush.msra.mxu2 %v1672_v48 }
 0x76c   :  { %793 = vmatpush.msra.mxu2 %v1676_v50 }
 0x76e   :  { %794 = vmatpush.msra.mxu2 %v1682_v52 }
 0x770   :  { %795 = vmatpush.msra.mxu2 %v1688_v55 }
 0x7de   :  { %v585_v17 = vpop.f32.mrf.mxu1 }
 0x7df   :  { %v588_v18 = vadd.f32 %v585_v17, %v110_v16 }
 0x7e1   :  { %v1387_v19 = vmul.f32 -1.442695, %v588_v18 }
 0x7e3   :  { %1465 = vpow2.f32 %v1387_v19 }
 0x7e4   :  { %v526_v23 = vpop.f32.mrf.mxu3 }
 0x7e9   :  { %v1466_v20 = vpop.eup %1465 }
 0x7ea   :  { %v592_v21 = vadd.f32 1.0, %v1466_v20  ;;  %v78_v20 = vld [vmem:[#allocation2 + $0x20] sm:$0xff] }
 0x7eb   :  { %111 = vmatmul.f32.gmra.mxu0 %v78_v20 }
 0x7ec   :  { %1467 = vrcp.f32 %v592_v21  ;;  %v501_v24 = vpop.f32.mrf.mxu2  ;;  %v604_v31 = vand.u32 2147483648, %v592_v21  ;;  %v602_v33 = vand.u32 2147483647, %v592_v21  ;;  %vm598_vm7 = vweird.f32 %v592_v21 }
 0x7ed   :  { %v527_v25 = vadd.f32 %v526_v23, %v501_v24 }
 0x7ee   :  { %v605_v37 = vor.u32 1.1754944e-38, %v604_v31  ;;  %vm603_vm9 = vcmp.eq.f32.partialorder %v602_v33, 8.507059e+37 }
 0x7ef   :  { %v529_v26 = vadd.f32 %v1721_v2, %v527_v25 }
 0x7f1   :  { %v1384_v27 = vmul.f32 -1.442695, %v529_v26 }
 0x7f2   :  { %v1468_v28 = vpop.eup %1467 }
 0x7f3   :  { %v594_v29 = vmul.f32 %v1468_v28, %v592_v21  ;;  %1469 = vpow2.f32 %v1384_v27  ;;  %vm599_vm6 = vweird.f32 %v1468_v28 }
 0x7f4   :  { %vm600_vm8 = vmor %vm598_vm7, %vm599_vm6 }
 0x7f5   :  { %v595_v30 = vsub.f32 1.0, %v594_v29 }
 0x7f7   :  { %v596_v32 = vmul.f32 %v1468_v28, %v595_v30 }
 0x7f9   :  { %v1470_v34 = vpop.eup %1469  ;;  %v597_v35 = vadd.f32 %v1468_v28, %v596_v32 }
 0x7fa   :  { %v533_v36 = vadd.f32 1.0, %v1470_v34 }
 0x7fb   :  { %v601_v38 = vsel %vm600_vm8, %v1468_v28, %v597_v35 }
 0x7fc   :  { %1471 = vrcp.f32 %v533_v36  ;;  %v606_v39 = vsel %vm603_vm9, %v605_v37, %v601_v38  ;;  %v545_v45 = vand.u32 2147483648, %v533_v36  ;;  %v543_v57 = vand.u32 2147483647, %v533_v36 }
 0x7fd   :  { %v608_v40 = vmul.f32 2.0, %v606_v39  ;;  %vm539_vm11 = vweird.f32 %v533_v36  ;;  %v610_v47 = vmul.f32 %v606_v39, %v1766_v6 }
 0x7fe   :  { %v546_v60 = vor.u32 1.1754944e-38, %v545_v45  ;;  %vm544_vm13 = vcmp.eq.f32.partialorder %v543_v57, 8.507059e+37 }
 0x7ff   :  { %v1388_v41 = vadd.f32 -1.0, %v608_v40 }
 0x801   :  { %612 = vrot.lane.b32.xlu0 %v1388_v41, %s1618_s0 }
 0x802   :  { %v1472_v42 = vpop.eup %1471 }
 0x803   :  { %v535_v43 = vmul.f32 %v1472_v42, %v533_v36  ;;  %vm540_vm10 = vweird.f32 %v1472_v42 }
 0x804   :  { %vm541_vm12 = vmor %vm539_vm11, %vm540_vm10 }
 0x805   :  { %v536_v44 = vsub.f32 1.0, %v535_v43 }
 0x807   :  { %v537_v54 = vmul.f32 %v1472_v42, %v536_v44 }
 0x809   :  { %v538_v58 = vadd.f32 %v1472_v42, %v537_v54 }
 0x80b   :  { %v542_v61 = vsel %vm541_vm12, %v1472_v42, %v538_v58 }
 0x80c   :  { %v547_v62 = vsel %vm544_vm13, %v546_v60, %v542_v61 }
 0x80d   :  { %v549_v63 = vmul.f32 2.0, %v547_v62  ;;  %v551_v14 = vmul.f32 %v547_v62, %v1761_v0 }
 0x80f   :  { %v1385_v46 = vadd.f32 -1.0, %v549_v63 }
 0x811   :  { %553 = vrot.lane.b32.xlu2 %v1385_v46, %s1618_s0 }
 0x868   :  { %v112_v23 = vpop.f32.mrf.mxu0 }
 0x869   :  { %v113_v24 = vadd.f32 %v1663_v22, %v112_v23 }
 0x86b   :  { %v554_v1 = vpop.permute.xlu2 %553 }
 0x86c   :  { %v556_v3 = vmul.f32 %v554_v1, %v547_v62 }
 0x86e   :  { %558 = vrot.lane.b32.xlu1 %v556_v3, %s1619_s1 }
 0x873   :  { %v613_v7 = vpop.permute.xlu0 %612 }
 0x874   :  { %v615_v10 = vmul.f32 %v613_v7, %v606_v39 }
 0x876   :  { %617 = vrot.lane.b32.xlu2 %v615_v10, %s1619_s1 }
 0x8d0   :  { %v618_v11 = vpop.permute.xlu2 %617 }
 0x8d1   :  { %v1794_v12 = vadd.f32 %v618_v11, %v610_v47 }
 0x8d3   :  { %1473 = vtanh.f32 %v1794_v12 }
 0x8d9   :  { %v1474_v13 = vpop.eup %1473 }
 0x8da   :  { %623 = vrot.lane.b32.xlu1 %v1474_v13, %s1618_s0 }
 0x8e0   :  { %v559_v59 = vpop.permute.xlu1 %558 }
 0x8e1   :  { %v1799_v15 = vadd.f32 %v559_v59, %v551_v14 }
 0x8e3   :  { %1475 = vtanh.f32 %v1799_v15 }
 0x8e9   :  { %v1476_v16 = vpop.eup %1475 }
 0x8ea   :  { %564 = vrot.lane.b32.xlu0 %v1476_v16, %s1618_s0 }
 0x94c   :  { %v624_v17 = vpop.permute.xlu1 %623 }
 0x94d   :  { %v626_v6 = vmul.f32 %v624_v17, %v606_v39 }
 0x94f   :  { %653 = vrot.lane.b32.xlu0 %v626_v6, %s1619_s1 }
 0x95c   :  { %v565_v18 = vpop.permute.xlu0 %564 }
 0x95d   :  { %v567_v19 = vmul.f32 %v565_v18, %v547_v62 }
 0x95f   :  { %628 = vrot.lane.b32.xlu2 %v567_v19, %s1619_s1 }
 0x9b9   :  { %v629_v21 = vpop.permute.xlu2 %628 }
 0x9ba   :  { %1389 = vmatmul.msk.f32.vlgmr.msrb.gmra.mxu2 %vm125_vm4, %v629_v21 }
 0x9bb   :  { %940 = vmatpush.msrb.mxu2 %v1672_v48 }
 0x9bd   :  { %941 = vmatpush.msrb.mxu2 %v1676_v50 }
 0x9bf   :  { %942 = vmatpush.msrb.mxu2 %v1682_v52 }
 0x9c1   :  { %v654_v0 = vpop.permute.xlu0 %653  ;;  %943 = vmatpush.msrb.mxu2 %v1688_v55 }
 0x9c2   :  { %1390 = vmatmul.msk.f32.vlgmr.msrb.gmra.mxu3 %vm125_vm4, %v654_v0  ;;  %1393 = vmatmul.msk.f32.vlgmr.msra.gmra.mxu1 %vm125_vm4, %v654_v0 }
 0x9c3   :  { %965 = vmatpush.msrb.mxu3 %v1674_v49  ;;  %1024 = vmatpush.msra.mxu1 %v1642_v4 }
 0x9c5   :  { %966 = vmatpush.msrb.mxu3 %v1680_v51  ;;  %1025 = vmatpush.msra.mxu1 %v1645_v5 }
 0x9c7   :  { %967 = vmatpush.msrb.mxu3 %v1684_v53  ;;  %1026 = vmatpush.msra.mxu1 %v1647_v8 }
 0x9c9   :  { %968 = vmatpush.msrb.mxu3 %v1690_v56  ;;  %1027 = vmatpush.msra.mxu1 %v1650_v9 }
 0xa3d   :  { %v649_v28 = vpop.f32.mrf.mxu2 }
 0xa3f   :  { %v733_v25 = vpop.f32.mrf.mxu1 }
 0xa40   :  { %v736_v26 = vadd.f32 %v733_v25, %v113_v24  ;;  %v79_v25 = vld [vmem:[#allocation2 + $0x28] sm:$0xff] }
 0xa41   :  { %114 = vmatmul.f32.gmra.mxu0 %v79_v25 }
 0xa42   :  { %v1394_v27 = vmul.f32 -1.442695, %v736_v26 }
 0xa44   :  { %1477 = vpow2.f32 %v1394_v27 }
 0xa45   :  { %v674_v29 = vpop.f32.mrf.mxu3 }
 0xa46   :  { %v675_v30 = vadd.f32 %v674_v29, %v649_v28 }
 0xa48   :  { %v677_v31 = vadd.f32 %v1721_v2, %v675_v30 }
 0xa4a   :  { %v1478_v32 = vpop.eup %1477  ;;  %v1391_v33 = vmul.f32 -1.442695, %v677_v31 }
 0xa4b   :  { %v740_v34 = vadd.f32 1.0, %v1478_v32 }
 0xa4c   :  { %1479 = vpow2.f32 %v1391_v33 }
 0xa4d   :  { %1481 = vrcp.f32 %v740_v34  ;;  %v752_v40 = vand.u32 2147483648, %v740_v34  ;;  %v750_v42 = vand.u32 2147483647, %v740_v34  ;;  %vm746_vm15 = vweird.f32 %v740_v34 }
 0xa4f   :  { %v753_v45 = vor.u32 1.1754944e-38, %v752_v40  ;;  %vm751_vm1 = vcmp.eq.f32.partialorder %v750_v42, 8.507059e+37 }
 0xa52   :  { %v1480_v35 = vpop.eup %1479 }
 0xa53   :  { %v1482_v36 = vpop.eup %1481  ;;  %v681_v37 = vadd.f32 1.0, %v1480_v35 }
 0xa54   :  { %v742_v38 = vmul.f32 %v1482_v36, %v740_v34  ;;  %vm747_vm14 = vweird.f32 %v1482_v36 }
 0xa55   :  { %1483 = vrcp.f32 %v681_v37  ;;  %vm748_vm0 = vmor %vm746_vm15, %vm747_vm14  ;;  %v693_v62 = vand.u32 2147483648, %v681_v37  ;;  %v691_v1 = vand.u32 2147483647, %v681_v37  ;;  %vm687_vm3 = vweird.f32 %v681_v37 }
 0xa56   :  { %v743_v39 = vsub.f32 1.0, %v742_v38 }
 0xa57   :  { %v694_v7 = vor.u32 1.1754944e-38, %v693_v62  ;;  %vm692_vm6 = vcmp.eq.f32.partialorder %v691_v1, 8.507059e+37 }
 0xa58   :  { %v744_v41 = vmul.f32 %v1482_v36, %v743_v39 }
 0xa5a   :  { %v745_v43 = vadd.f32 %v1482_v36, %v744_v41 }
 0xa5b   :  { %v1484_v44 = vpop.eup %1483 }
 0xa5c   :  { %v683_v54 = vmul.f32 %v1484_v44, %v681_v37  ;;  %v749_v57 = vsel %vm748_vm0, %v1482_v36, %v745_v43  ;;  %vm688_vm2 = vweird.f32 %v1484_v44 }
 0xa5d   :  { %v754_v58 = vsel %vm751_vm1, %v753_v45, %v749_v57  ;;  %vm689_vm5 = vmor %vm687_vm3, %vm688_vm2 }
 0xa5e   :  { %v684_v60 = vsub.f32 1.0, %v683_v54  ;;  %v756_v61 = vmul.f32 2.0, %v754_v58  ;;  %v758_v6 = vmul.f32 %v754_v58, %v1794_v12 }
 0xa60   :  { %v1395_v63 = vadd.f32 -1.0, %v756_v61  ;;  %v685_v46 = vmul.f32 %v1484_v44, %v684_v60 }
 0xa62   :  { %760 = vrot.lane.b32.xlu2 %v1395_v63, %s1618_s0  ;;  %v686_v3 = vadd.f32 %v1484_v44, %v685_v46 }
 0xa64   :  { %v690_v10 = vsel %vm689_vm5, %v1484_v44, %v686_v3 }
 0xa65   :  { %v695_v47 = vsel %vm692_vm6, %v694_v7, %v690_v10 }
 0xa66   :  { %v697_v11 = vmul.f32 2.0, %v695_v47  ;;  %v699_v21 = vmul.f32 %v695_v47, %v1799_v15 }
 0xa68   :  { %v1392_v13 = vadd.f32 -1.0, %v697_v11 }
 0xa6a   :  { %701 = vrot.lane.b32.xlu1 %v1392_v13, %s1618_s0 }
 0xabc   :  { %v761_v14 = vpop.permute.xlu2 %760 }
 0xabd   :  { %v763_v59 = vmul.f32 %v761_v14, %v754_v58 }
 0xabf   :  { %765 = vrot.lane.b32.xlu1 %v763_v59, %s1619_s1 }
 0xadc   :  { %v702_v16 = vpop.permute.xlu1 %701 }
 0xadd   :  { %v704_v17 = vmul.f32 %v702_v16, %v695_v47 }
 0xadf   :  { %706 = vrot.lane.b32.xlu0 %v704_v17, %s1619_s1 }
 0xb31   :  { %v766_v18 = vpop.permute.xlu1 %765 }
 0xb32   :  { %v1827_v19 = vadd.f32 %v766_v18, %v758_v6 }
 0xb34   :  { %1485 = vtanh.f32 %v1827_v19 }
 0xb3a   :  { %v1486_v20 = vpop.eup %1485 }
 0xb3b   :  { %771 = vrot.lane.b32.xlu0 %v1486_v20, %s1618_s0 }
 0xb51   :  { %v707_v0 = vpop.permute.xlu0 %706 }
 0xb52   :  { %v1832_v23 = vadd.f32 %v707_v0, %v699_v21 }
 0xb54   :  { %1487 = vtanh.f32 %v1832_v23 }
 0xb5a   :  { %v1488_v24 = vpop.eup %1487 }
 0xb5b   :  { %712 = vrot.lane.b32.xlu2 %v1488_v24, %s1618_s0 }
 0xbad   :  { %v772_v12 = vpop.permute.xlu0 %771 }
 0xbae   :  { %v774_v26 = vmul.f32 %v772_v12, %v754_v58 }
 0xbb0   :  { %801 = vrot.lane.b32.xlu2 %v774_v26, %s1619_s1 }
 0xbb5   :  { %v713_v27 = vpop.permute.xlu2 %712 }
 0xbb6   :  { %v715_v28 = vmul.f32 %v713_v27, %v695_v47  ;;  %v80_v27 = vld [vmem:[#allocation2 + $0x30] sm:$0xff] }
 0xbb7   :  { %117 = vmatmul.f32.gmra.mxu0 %v80_v27 }
 0xbb8   :  { %776 = vrot.lane.b32.xlu1 %v715_v28, %s1619_s1 }
 0xc0a   :  { %v802_v29 = vpop.permute.xlu2 %801 }
 0xc0b   :  { %1397 = vmatmul.msk.f32.vlgmr.msra.gmra.mxu3 %vm125_vm4, %v802_v29  ;;  %1400 = vmatmul.msk.f32.vlgmr.msrb.gmra.mxu1 %vm125_vm4, %v802_v29 }
 0xc0c   :  { %1113 = vmatpush.msra.mxu3 %v1674_v49  ;;  %1172 = vmatpush.msrb.mxu1 %v1642_v4  ;;  %v115_v4 = vpop.f32.mrf.mxu0 }
 0xc0e   :  { %1114 = vmatpush.msra.mxu3 %v1680_v51  ;;  %1173 = vmatpush.msrb.mxu1 %v1645_v5  ;;  %v116_v5 = vadd.f32 %v1663_v22, %v115_v4  ;;  %v1531_v4 = vld [vmem:[#allocation5 + $0xe0] sm:$0xff] }
 0xc10   :  { %1115 = vmatpush.msra.mxu3 %v1684_v53  ;;  %1174 = vmatpush.msrb.mxu1 %v1647_v8 }
 0xc12   :  { %1116 = vmatpush.msra.mxu3 %v1690_v56  ;;  %1175 = vmatpush.msrb.mxu1 %v1650_v9 }
 0xc2a   :  { %v777_v15 = vpop.permute.xlu1 %776 }
 0xc2b   :  { %1396 = vmatmul.msk.f32.vlgmr.msra.gmra.mxu2 %vm125_vm4, %v777_v15 }
 0xc2c   :  { %1088 = vmatpush.msra.mxu2 %v1672_v48 }
 0xc2e   :  { %1089 = vmatpush.msra.mxu2 %v1676_v50 }
 0xc30   :  { %1090 = vmatpush.msra.mxu2 %v1682_v52 }
 0xc32   :  { %1091 = vmatpush.msra.mxu2 %v1688_v55 }
 0xc88   :  { %v881_v30 = vpop.f32.mrf.mxu1 }
 0xc89   :  { %v884_v8 = vadd.f32 %v881_v30, %v116_v5  ;;  %v1532_v5 = vld [vmem:[#allocation5 + $0xd8] sm:$0xff]  ;;  %v118_v30 = vpop.f32.mrf.mxu0 }
 0xc8b   :  { %v1401_v31 = vmul.f32 -1.442695, %v884_v8  ;;  %v1880_v8 = vld [vmem:[#allocation5 + $0x80] ss:$0 sm:$0xff] }
 0xc8d   :  { %1489 = vpow2.f32 %v1401_v31 }
 0xc8e   :  { %v822_v42 = vpop.f32.mrf.mxu3 }
 0xc93   :  { %v1490_v32 = vpop.eup %1489 }
 0xc94   :  { %v888_v9 = vadd.f32 1.0, %v1490_v32 }
 0xc96   :  { %1491 = vrcp.f32 %v888_v9  ;;  %v900_v48 = vand.u32 2147483648, %v888_v9  ;;  %v898_v50 = vand.u32 2147483647, %v888_v9  ;;  %vm894_vm8 = vweird.f32 %v888_v9 }
 0xc98   :  { %v901_v38 = vor.u32 1.1754944e-38, %v900_v48  ;;  %vm899_vm10 = vcmp.eq.f32.partialorder %v898_v50, 8.507059e+37 }
 0xc9c   :  { %v1492_v33 = vpop.eup %1491 }
 0xc9d   :  { %v890_v34 = vmul.f32 %v1492_v33, %v888_v9  ;;  %vm895_vm7 = vweird.f32 %v1492_v33 }
 0xc9e   :  { %vm896_vm9 = vmor %vm894_vm8, %vm895_vm7 }
 0xc9f   :  { %v891_v35 = vsub.f32 1.0, %v890_v34 }
 0xca1   :  { %v892_v36 = vmul.f32 %v1492_v33, %v891_v35 }
 0xca3   :  { %v893_v37 = vadd.f32 %v1492_v33, %v892_v36 }
 0xca5   :  { %v897_v39 = vsel %vm896_vm9, %v1492_v33, %v893_v37 }
 0xca6   :  { %v902_v22 = vsel %vm899_vm10, %v901_v38, %v897_v39 }
 0xca7   :  { %v904_v40 = vmul.f32 2.0, %v902_v22  ;;  %v906_v6 = vmul.f32 %v902_v22, %v1827_v19 }
 0xca9   :  { %v1402_v41 = vadd.f32 -1.0, %v904_v40 }
 0xcab   :  { %908 = vrot.lane.b32.xlu1 %v1402_v41, %s1618_s0 }
 0xcae   :  { %v797_v43 = vpop.f32.mrf.mxu2 }
 0xcaf   :  { %v823_v44 = vadd.f32 %v822_v42, %v797_v43 }
 0xcb1   :  { %v825_v45 = vadd.f32 %v1721_v2, %v823_v44 }
 0xcb3   :  { %v1398_v54 = vmul.f32 -1.442695, %v825_v45 }
 0xcb5   :  { %1493 = vpow2.f32 %v1398_v54 }
 0xcbb   :  { %v1494_v57 = vpop.eup %1493 }
 0xcbc   :  { %v829_v58 = vadd.f32 1.0, %v1494_v57 }
 0xcbe   :  { %1495 = vrcp.f32 %v829_v58  ;;  %v841_v63 = vand.u32 2147483648, %v829_v58  ;;  %v839_v1 = vand.u32 2147483647, %v829_v58  ;;  %vm835_vm12 = vweird.f32 %v829_v58 }
 0xcc0   :  { %v842_v7 = vor.u32 1.1754944e-38, %v841_v63  ;;  %vm840_vm14 = vcmp.eq.f32.partialorder %v839_v1, 8.507059e+37 }
 0xcc4   :  { %v1496_v60 = vpop.eup %1495 }
 0xcc5   :  { %v831_v61 = vmul.f32 %v1496_v60, %v829_v58  ;;  %vm836_vm11 = vweird.f32 %v1496_v60 }
 0xcc6   :  { %vm837_vm13 = vmor %vm835_vm12, %vm836_vm11 }
 0xcc7   :  { %v832_v62 = vsub.f32 1.0, %v831_v61 }
 0xcc9   :  { %v833_v46 = vmul.f32 %v1496_v60, %v832_v62 }
 0xccb   :  { %v834_v3 = vadd.f32 %v1496_v60, %v833_v46 }
 0xccd   :  { %v838_v10 = vsel %vm837_vm13, %v1496_v60, %v834_v3 }
 0xcce   :  { %v843_v47 = vsel %vm840_vm14, %v842_v7, %v838_v10 }
 0xccf   :  { %v845_v11 = vmul.f32 2.0, %v843_v47  ;;  %v847_v0 = vmul.f32 %v843_v47, %v1832_v23 }
 0xcd1   :  { %v1399_v13 = vadd.f32 -1.0, %v845_v11 }
 0xcd3   :  { %849 = vrot.lane.b32.xlu0 %v1399_v13, %s1618_s0 }
 0xd1d   :  { %v909_v14 = vpop.permute.xlu1 %908 }
 0xd1e   :  { %v911_v59 = vmul.f32 %v909_v14, %v902_v22 }
 0xd20   :  { %913 = vrot.lane.b32.xlu0 %v911_v59, %s1619_s1 }
 0xd45   :  { %v850_v16 = vpop.permute.xlu0 %849 }
 0xd46   :  { %v852_v17 = vmul.f32 %v850_v16, %v843_v47 }
 0xd48   :  { %854 = vrot.lane.b32.xlu2 %v852_v17, %s1619_s1 }
 0xd92   :  { %v914_v18 = vpop.permute.xlu0 %913 }
 0xd93   :  { %v1860_v20 = vadd.f32 %v914_v18, %v906_v6 }
 0xd95   :  { %1497 = vtanh.f32 %v1860_v20 }
 0xd9b   :  { %v1498_v21 = vpop.eup %1497 }
 0xd9c   :  { %919 = vrot.lane.b32.xlu2 %v1498_v21, %s1618_s0 }
 0xda2   :  { %v855_v24 = vpop.permute.xlu2 %854 }
 0xda3   :  { %v1865_v25 = vadd.f32 %v855_v24, %v847_v0 }
 0xda5   :  { %1499 = vtanh.f32 %v1865_v25 }
 0xdab   :  { %v1500_v12 = vpop.eup %1499 }
 0xdac   :  { %860 = vrot.lane.b32.xlu1 %v1500_v12, %s1618_s0  ;;  %v81_v12 = vld [vmem:[#allocation2 + $0x38] sm:$0xff] }
 0xdad   :  { %120 = vmatmul.f32.gmra.mxu0 %v81_v12 }
 0xdf6   :  { %v920_v26 = vpop.permute.xlu2 %919 }
 0xdf7   :  { %v922_v19 = vmul.f32 %v920_v26, %v902_v22 }
 0xdf9   :  { %949 = vrot.lane.b32.xlu1 %v922_v19, %s1619_s1 }
 0xe1e   :  { %v861_v28 = vpop.permute.xlu1 %860 }
 0xe1f   :  { %v863_v29 = vmul.f32 %v861_v28, %v843_v47 }
 0xe21   :  { %924 = vrot.lane.b32.xlu0 %v863_v29, %s1619_s1 }
 0xe2a   :  { %v121_v28 = vpop.f32.mrf.mxu0 }
 0xe2b   :  { %v122_v29 = vadd.f32 %v1880_v8, %v121_v28 }
 0xe6b   :  { %v950_v15 = vpop.permute.xlu1 %949 }
 0xe6c   :  { %1404 = vmatmul.msk.f32.vlgmr.msrb.gmra.mxu3 %vm125_vm4, %v950_v15  ;;  %1407 = vmatmul.msk.f32.vlgmr.msra.gmra.mxu1 %vm125_vm4, %v950_v15 }
 0xe6d   :  { %1261 = vmatpush.msrb.mxu3 %v1674_v49  ;;  %v119_v49 = vadd.f32 %v1880_v8, %v118_v30 }
 0xe6f   :  { %1262 = vmatpush.msrb.mxu3 %v1680_v51 }
 0xe71   :  { %1263 = vmatpush.msrb.mxu3 %v1684_v53 }
 0xe73   :  { %1264 = vmatpush.msrb.mxu3 %v1690_v56 }
 0xe93   :  { %v925_v23 = vpop.permute.xlu0 %924 }
 0xe94   :  { %1403 = vmatmul.msk.f32.vlgmr.msrb.gmra.mxu2 %vm125_vm4, %v925_v23 }
 0xe95   :  { %1236 = vmatpush.msrb.mxu2 %v1531_v4 }
 0xe97   :  { %1237 = vmatpush.msrb.mxu2 %v1532_v5 }
 0xe99   :  { %1238 = vmatpush.msrb.mxu2 %v1682_v52 }
 0xe9b   :  { %1239 = vmatpush.msrb.mxu2 %v1688_v55 }
 0xee9   :  { %v1029_v51 = vpop.f32.mrf.mxu1 }
 0xeea   :  { %v1032_v53 = vadd.f32 %v1029_v51, %v119_v49 }
 0xeec   :  { %v1408_v31 = vmul.f32 -1.442695, %v1032_v53 }
 0xeee   :  { %1501 = vpow2.f32 %v1408_v31 }
 0xeef   :  { %v970_v22 = vpop.f32.mrf.mxu3 }
 0xef4   :  { %v1502_v56 = vpop.eup %1501 }
 0xef5   :  { %v1036_v32 = vadd.f32 1.0, %v1502_v56 }
 0xef7   :  { %1503 = vrcp.f32 %v1036_v32  ;;  %v1048_v35 = vand.u32 2147483648, %v1036_v32  ;;  %v1046_v52 = vand.u32 2147483647, %v1036_v32  ;;  %vm1042_vm0 = vweird.f32 %v1036_v32 }
 0xef9   :  { %v1049_v36 = vor.u32 1.1754944e-38, %v1048_v35  ;;  %vm1047_vm2 = vcmp.eq.f32.partialorder %v1046_v52, 8.507059e+37 }
 0xefd   :  { %v1504_v9 = vpop.eup %1503 }
 0xefe   :  { %v1038_v33 = vmul.f32 %v1504_v9, %v1036_v32  ;;  %vm1043_vm15 = vweird.f32 %v1504_v9 }
 0xeff   :  { %vm1044_vm1 = vmor %vm1042_vm0, %vm1043_vm15 }
 0xf00   :  { %v1039_v34 = vsub.f32 1.0, %v1038_v33 }
 0xf02   :  { %v1040_v48 = vmul.f32 %v1504_v9, %v1039_v34 }
 0xf04   :  { %v1041_v55 = vadd.f32 %v1504_v9, %v1040_v48 }
 0xf06   :  { %v1045_v50 = vsel %vm1044_vm1, %v1504_v9, %v1041_v55 }
 0xf07   :  { %v1050_v37 = vsel %vm1047_vm2, %v1049_v36, %v1045_v50  ;;  %v1534_v36 = vld [vmem:[#allocation5 + $0xe8] ss:$0 sm:$0xff] }
 0xf08   :  { %v1052_v38 = vmul.f32 2.0, %v1050_v37  ;;  %v1054_v14 = vmul.f32 %v1050_v37, %v1860_v20 }
 0xf0a   :  { %v1409_v39 = vadd.f32 -1.0, %v1052_v38 }
 0xf0c   :  { %1056 = vrot.lane.b32.xlu0 %v1409_v39, %s1618_s0 }
 0xf17   :  { %v945_v40 = vpop.f32.mrf.mxu2 }
 0xf18   :  { %v971_v41 = vadd.f32 %v970_v22, %v945_v40 }
 0xf1a   :  { %v973_v42 = vadd.f32 %v1721_v2, %v971_v41 }
 0xf1c   :  { %v1405_v43 = vmul.f32 -1.442695, %v973_v42 }
 0xf1e   :  { %1505 = vpow2.f32 %v1405_v43 }
 0xf24   :  { %v1506_v44 = vpop.eup %1505 }
 0xf25   :  { %v977_v45 = vadd.f32 1.0, %v1506_v44 }
 0xf27   :  { %1507 = vrcp.f32 %v977_v45  ;;  %v989_v60 = vand.u32 2147483648, %v977_v45  ;;  %v987_v62 = vand.u32 2147483647, %v977_v45  ;;  %vm983_vm5 = vweird.f32 %v977_v45 }
 0xf29   :  { %v990_v46 = vor.u32 1.1754944e-38, %v989_v60  ;;  %vm988_vm7 = vcmp.eq.f32.partialorder %v987_v62, 8.507059e+37 }
 0xf2d   :  { %v1508_v54 = vpop.eup %1507 }
 0xf2e   :  { %v979_v57 = vmul.f32 %v1508_v54, %v977_v45  ;;  %vm984_vm3 = vweird.f32 %v1508_v54 }
 0xf2f   :  { %vm985_vm6 = vmor %vm983_vm5, %vm984_vm3 }
 0xf30   :  { %v980_v58 = vsub.f32 1.0, %v979_v57 }
 0xf32   :  { %v981_v61 = vmul.f32 %v1508_v54, %v980_v58 }
 0xf34   :  { %v982_v63 = vadd.f32 %v1508_v54, %v981_v61 }
 0xf36   :  { %v986_v1 = vsel %vm985_vm6, %v1508_v54, %v982_v63 }
 0xf37   :  { %v991_v3 = vsel %vm988_vm7, %v990_v46, %v986_v1 }
 0xf38   :  { %v993_v2 = vmul.f32 2.0, %v991_v3  ;;  %v995_v6 = vmul.f32 %v991_v3, %v1865_v25 }
 0xf3a   :  { %v1406_v7 = vadd.f32 -1.0, %v993_v2 }
 0xf3c   :  { %997 = vrot.lane.b32.xlu2 %v1406_v7, %s1618_s0 }
 0xf7e   :  { %v1057_v10 = vpop.permute.xlu0 %1056 }
 0xf7f   :  { %v1059_v47 = vmul.f32 %v1057_v10, %v1050_v37 }
 0xf81   :  { %1061 = vrot.lane.b32.xlu2 %v1059_v47, %s1619_s1 }
 0xf96   :  { %v998_v11 = vpop.permute.xlu2 %997 }
 0xf97   :  { %v1000_v13 = vmul.f32 %v998_v11, %v991_v3 }
 0xf99   :  { %1002 = vrot.lane.b32.xlu1 %v1000_v13, %s1619_s1 }
 0xfdb   :  { %v1062_v59 = vpop.permute.xlu2 %1061 }
 0xfdc   :  { %v1889_v16 = vadd.f32 %v1062_v59, %v1054_v14 }
 0xfde   :  { %1509 = vtanh.f32 %v1889_v16 }
 0xfe4   :  { %v1510_v17 = vpop.eup %1509 }
 0xfe5   :  { %1067 = vrot.lane.b32.xlu1 %v1510_v17, %s1618_s0 }
0x100b   :  { %v1003_v18 = vpop.permute.xlu1 %1002 }
0x100c   :  { %v1894_v21 = vadd.f32 %v1003_v18, %v995_v6 }
0x100e   :  { %1511 = vtanh.f32 %v1894_v21 }
0x1014   :  { %v1512_v0 = vpop.eup %1511 }
0x1015   :  { %1008 = vrot.lane.b32.xlu0 %v1512_v0, %s1618_s0 }
0x1057   :  { %v1068_v24 = vpop.permute.xlu1 %1067 }
0x1058   :  { %v1070_v20 = vmul.f32 %v1068_v24, %v1050_v37 }
0x105a   :  { %1097 = vrot.lane.b32.xlu0 %v1070_v20, %s1619_s1 }
0x1087   :  { %v1009_v26 = vpop.permute.xlu0 %1008 }
0x1088   :  { %v1011_v19 = vmul.f32 %v1009_v26, %v991_v3 }
0x108a   :  { %1072 = vrot.lane.b32.xlu2 %v1011_v19, %s1619_s1 }
0x10cc   :  { %v1098_v27 = vpop.permute.xlu0 %1097 }
0x10cd   :  { %1411 = vmatmul.msk.f32.vlgmr.msra.gmra.mxu3 %vm125_vm4, %v1098_v27  ;;  %1414 = vmatmul.msk.f32.vlgmr.msrb.gmra.mxu1 %vm125_vm4, %v1098_v27 }
0x10e4   :  { %v1073_v25 = vpop.permute.xlu2 %1072 }
0x10e5   :  { %1410 = vmatmul.msk.f32.vlgmr.msra.gmra.mxu2 %vm125_vm4, %v1073_v25 }
0x114a   :  { %v1177_v15 = vpop.f32.mrf.mxu1 }
0x114b   :  { %v1180_v23 = vadd.f32 %v1177_v15, %v122_v29 }
0x114d   :  { %v1415_v4 = vmul.f32 -1.442695, %v1180_v23 }
0x114f   :  { %1513 = vpow2.f32 %v1415_v4 }
0x1150   :  { %v1118_v8 = vpop.f32.mrf.mxu3 }
0x1155   :  { %v1514_v5 = vpop.eup %1513 }
0x1156   :  { %v1184_v30 = vadd.f32 1.0, %v1514_v5 }
0x1158   :  { %1515 = vrcp.f32 %v1184_v30  ;;  %v1196_v31 = vand.u32 2147483648, %v1184_v30  ;;  %v1194_v32 = vand.u32 2147483647, %v1184_v30  ;;  %vm1190_vm9 = vweird.f32 %v1184_v30 }
0x115a   :  { %v1197_v33 = vor.u32 1.1754944e-38, %v1196_v31  ;;  %vm1195_vm11 = vcmp.eq.f32.partialorder %v1194_v32, 8.507059e+37 }
0x115e   :  { %v1516_v49 = vpop.eup %1515 }
0x115f   :  { %v1186_v51 = vmul.f32 %v1516_v49, %v1184_v30  ;;  %vm1191_vm8 = vweird.f32 %v1516_v49 }
0x1160   :  { %vm1192_vm10 = vmor %vm1190_vm9, %vm1191_vm8 }
0x1161   :  { %v1187_v53 = vsub.f32 1.0, %v1186_v51 }
0x1163   :  { %v1188_v56 = vmul.f32 %v1516_v49, %v1187_v53 }
0x1165   :  { %v1189_v9 = vadd.f32 %v1516_v49, %v1188_v56 }
0x1167   :  { %v1193_v34 = vsel %vm1192_vm10, %v1516_v49, %v1189_v9 }
0x1168   :  { %v1093_v35 = vpop.f32.mrf.mxu2  ;;  %v1198_v48 = vsel %vm1195_vm11, %v1197_v33, %v1193_v34 }
0x1169   :  { %v1119_v52 = vadd.f32 %v1118_v8, %v1093_v35  ;;  %v1200_v55 = vmul.f32 2.0, %v1198_v48  ;;  %v1202_v2 = vmul.f32 %v1198_v48, %v1889_v16 }
0x116b   :  { %v1121_v50 = vadd.f32 %v1534_v36, %v1119_v52  ;;  %v1416_v37 = vadd.f32 -1.0, %v1200_v55  ;;  %v1310_v52 = vld [vmem:[#allocation5 + $0x100] sm:$0xff]  ;;  %v1309_v55 = vld [vmem:[#allocation5 + $0xf8] sm:$0xff] }
0x116d   :  { %v1412_v38 = vmul.f32 -1.442695, %v1121_v50  ;;  %1204 = vrot.lane.b32.xlu2 %v1416_v37, %s1618_s0 }
0x116f   :  { %1517 = vpow2.f32 %v1412_v38 }
0x1175   :  { %v1518_v39 = vpop.eup %1517 }
0x1176   :  { %v1125_v22 = vadd.f32 1.0, %v1518_v39  ;;  %v1432_v39 = vld [vmem:[#allocation5 + $0x110] ss:$0 sm:$0xff] }
0x1178   :  { %1519 = vrcp.f32 %v1125_v22  ;;  %v1137_v43 = vand.u32 2147483648, %v1125_v22  ;;  %v1135_v45 = vand.u32 2147483647, %v1125_v22  ;;  %vm1131_vm13 = vweird.f32 %v1125_v22 }
0x117a   :  { %v1138_v57 = vor.u32 1.1754944e-38, %v1137_v43  ;;  %vm1136_vm15 = vcmp.eq.f32.partialorder %v1135_v45, 8.507059e+37 }
0x117e   :  { %v1520_v40 = vpop.eup %1519 }
0x117f   :  { %v1127_v41 = vmul.f32 %v1520_v40, %v1125_v22  ;;  %vm1132_vm12 = vweird.f32 %v1520_v40 }
0x1180   :  { %vm1133_vm14 = vmor %vm1131_vm13, %vm1132_vm12 }
0x1181   :  { %v1128_v42 = vsub.f32 1.0, %v1127_v41  ;;  %v1433_v41 = vld [vmem:[#allocation5 + $0x118] ss:$0 sm:$0xff] }
0x1183   :  { %v1129_v44 = vmul.f32 %v1520_v40, %v1128_v42 }
0x1185   :  { %v1130_v54 = vadd.f32 %v1520_v40, %v1129_v44  ;;  %v1434_v44 = vld [vmem:[#allocation5 + $0x120] ss:$0 sm:$0xff] }
0x1187   :  { %v1134_v58 = vsel %vm1133_vm14, %v1520_v40, %v1130_v54 }
0x1188   :  { %v1139_v60 = vsel %vm1136_vm15, %v1138_v57, %v1134_v58 }
0x1189   :  { %v1141_v61 = vmul.f32 2.0, %v1139_v60  ;;  %v1143_v11 = vmul.f32 %v1139_v60, %v1894_v21 }
0x118b   :  { %v1413_v62 = vadd.f32 -1.0, %v1141_v61 }
0x118d   :  { %1145 = vrot.lane.b32.xlu1 %v1413_v62, %s1618_s0 }
0x11c7   :  { %v1205_v63 = vpop.permute.xlu2 %1204 }
0x11c8   :  { %v1207_v46 = vmul.f32 %v1205_v63, %v1198_v48 }
0x11ca   :  { %1209 = vrot.lane.b32.xlu1 %v1207_v46, %s1619_s1 }
0x11ff   :  { %v1146_v1 = vpop.permute.xlu1 %1145 }
0x1200   :  { %v1148_v3 = vmul.f32 %v1146_v1, %v1139_v60 }
0x1202   :  { %1150 = vrot.lane.b32.xlu0 %v1148_v3, %s1619_s1 }
0x123c   :  { %v1210_v7 = vpop.permute.xlu1 %1209 }
0x123d   :  { %v1212_v10 = vadd.f32 %v1210_v7, %v1202_v2 }
0x123f   :  { %1521 = vtanh.f32 %v1212_v10 }
0x1245   :  { %v1522_v47 = vpop.eup %1521 }
0x1246   :  { %1215 = vrot.lane.b32.xlu0 %v1522_v47, %s1618_s0 }
0x1274   :  { %v1151_v13 = vpop.permute.xlu0 %1150 }
0x1275   :  { %v1153_v14 = vadd.f32 %v1151_v13, %v1143_v11 }
0x1277   :  { %1523 = vtanh.f32 %v1153_v14 }
0x127d   :  { %v1524_v59 = vpop.eup %1523 }
0x127e   :  { %1156 = vrot.lane.b32.xlu2 %v1524_v59, %s1618_s0 }
0x12b8   :  { %v1216_v17 = vpop.permute.xlu0 %1215 }
0x12b9   :  { %v1218_v6 = vmul.f32 %v1216_v17, %v1198_v48  ;;  %v1311_v48 = vld [vmem:[#allocation5 + $0x108] sm:$0xff] }
0x12ba   :  { %1333 = vmatpush.msra.mxu1 %v1311_v48 }
0x12bb   :  { %1245 = vrot.lane.b32.xlu2 %v1218_v6, %s1619_s1 }
0x12bc   :  { %1334 = vmatpush.msra.mxu1 %v1310_v52 }
0x12be   :  { %1335 = vmatpush.msra.mxu1 %v1309_v55 }
0x12d8   :  { %v1157_v18 = vpop.permute.xlu2 %1156 }
0x12d9   :  { %v1159_v16 = vmul.f32 %v1157_v18, %v1139_v60 }
0x12db   :  { %1220 = vrot.lane.b32.xlu1 %v1159_v16, %s1619_s1 }
0x1315   :  { %v1246_v0 = vpop.permute.xlu2 %1245 }
0x1316   :  { %1418 = vmatmul.msk.f32.vlgmr.msrb.gmra.mxu3 %vm125_vm4, %v1246_v0 }
0x134d   :  { %v1221_v24 = vpop.permute.xlu1 %1220 }
0x134e   :  { %1417 = vmatmul.msk.f32.vlgmr.msrb.gmra.mxu2 %vm125_vm4, %v1221_v24 }
0x1399   :  { %v1266_v21 = vpop.f32.mrf.mxu3 }
0x13d1   :  { %v1241_v20 = vpop.f32.mrf.mxu2 }
0x13d2   :  { %v1267_v12 = vadd.f32 %v1266_v21, %v1241_v20 }
0x13d4   :  { %v1269_v26 = vadd.f32 %v1534_v36, %v1267_v12  ;;  %v1308_v36 = vld [vmem:[#allocation5 + $0xf0] sm:$0xff] }
0x13d5   :  { %1336 = vmatpush.msra.mxu1 %v1308_v36 }
0x13d6   :  { %v1419_v19 = vmul.f32 -1.442695, %v1269_v26 }
0x13d8   :  { %1525 = vpow2.f32 %v1419_v19 }
0x13de   :  { %v1526_v27 = vpop.eup %1525 }
0x13df   :  { %v1273_v25 = vadd.f32 1.0, %v1526_v27 }
0x13e1   :  { %1527 = vrcp.f32 %v1273_v25  ;;  %v1285_v23 = vand.u32 2147483648, %v1273_v25  ;;  %v1283_v5 = vand.u32 2147483647, %v1273_v25  ;;  %vm1279_vm1 = vweird.f32 %v1273_v25 }
0x13e3   :  { %v1286_v49 = vor.u32 1.1754944e-38, %v1285_v23  ;;  %vm1284_vm3 = vcmp.eq.f32.partialorder %v1283_v5, 8.507059e+37 }
0x13e7   :  { %v1528_v28 = vpop.eup %1527 }
0x13e8   :  { %v1275_v29 = vmul.f32 %v1528_v28, %v1273_v25  ;;  %vm1280_vm0 = vweird.f32 %v1528_v28 }
0x13e9   :  { %vm1281_vm2 = vmor %vm1279_vm1, %vm1280_vm0 }
0x13ea   :  { %v1276_v15 = vsub.f32 1.0, %v1275_v29 }
0x13ec   :  { %v1277_v4 = vmul.f32 %v1528_v28, %v1276_v15 }
0x13ee   :  { %v1278_v30 = vadd.f32 %v1528_v28, %v1277_v4 }
0x13f0   :  { %v1282_v51 = vsel %vm1281_vm2, %v1528_v28, %v1278_v30 }
0x13f1   :  { %v1287_v53 = vsel %vm1284_vm3, %v1286_v49, %v1282_v51 }
0x13f2   :  { %v1289_v31 = vmul.f32 2.0, %v1287_v53  ;;  %v1291_v33 = vmul.f32 %v1287_v53, %v1153_v14 }
0x13f4   :  { %v1420_v56 = vadd.f32 -1.0, %v1289_v31 }
0x13f6   :  { %1293 = vrot.lane.b32.xlu0 %v1420_v56, %s1618_s0 }
0x1468   :  { %v1294_v32 = vpop.permute.xlu0 %1293 }
0x1469   :  { %v1296_v9 = vmul.f32 %v1294_v32, %v1287_v53 }
0x146b   :  { %1298 = vrot.lane.b32.xlu1 %v1296_v9, %s1619_s1 }
0x14dd   :  { %v1299_v34 = vpop.permute.xlu1 %1298 }
0x14de   :  { %v1301_v8 = vadd.f32 %v1299_v34, %v1291_v33 }
0x14e0   :  { %1529 = vtanh.f32 %v1301_v8 }
0x14e6   :  { %v1530_v35 = vpop.eup %1529 }
0x14e7   :  { %1304 = vrot.lane.b32.xlu2 %v1530_v35, %s1618_s0 }
0x1541   :  { %v1305_v50 = vpop.permute.xlu2 %1304 }
0x1542   :  { %v1307_v37 = vmul.f32 %v1305_v50, %v1287_v53 }
0x1544   :  { %1317 = vrot.lane.b32.xlu0 %v1307_v37, %s1619_s1 }
0x15b6   :  { %v1318_v38 = vpop.permute.xlu0 %1317 }
0x15b7   :  { %1421 = vmatmul.msk.f32.vlgmr.msra.gmra.mxu1 %vm125_vm4, %v1318_v38 }
0x1634   :  { %v1338_v22 = vpop.f32.mrf.mxu1 }
0x1635   :  { %v1339_v40 = vadd.f32 %v1432_v39, %v1338_v22 }
0x1637   :  { %v1341_v42 = vmax.f32 %v1339_v40, 0.0 }
0x1639   :  { %v1343_v43 = vmul.f32 %v1433_v41, %v1341_v42 }
0x163b   :  { %1344 = vadd.xlane.f32.xlu1 %v1343_v43 }
0x16ae   :  { %v1345_v45 = vpop.xlane.xlu1 %1344 }
0x16af   :  { %v1347_v54 = vadd.f32 %v1434_v44, %v1345_v45 }
0x16b1   :  { %1348 = vst [vmem:[#allocation7] sm:$0xff] %v1347_v54 }
0x16b2   :  { %1359 = dma.vmem_to_hbm [thread:$0]  %s1355_s22, 128, %s1357_s25, [#allocation4]  }
0x16b3   :  { %1611 = dma.done.wait [#allocation4], 128  }
0x16b4   :  { %1612 = vsyncadd [#allocation4], 4294967168 }
0x16b5   :  { %1364 = vsyncpa [#allocation3], 1 }
0x16b6   :  { %1365 = vsyncpa [#allocation6], 1 }
0x16b7   :  { %1366 = vsyncpa [#allocation4], 1 }

</bundles_post_ra>
